<compile_context>
chip_gen: v6e
topology: v6e:2x2x1
jax: 0.10.0
libtpu: 0.0.40
codegen_flags: <defaults>
</compile_context>

<pallas_src>
import functools

import jax
import jax.numpy as jnp
from jax.experimental import pallas as pl
from jax.experimental.pallas import tpu as pltpu

LEAK = 0.2           # F.leaky_relu(negative_slope=0.2)
LANE_TILE_CAP = 256  # lane tile for the M = B*OH*OW axis (multiple of 128)


def _round_up(x, m):
    return (x + m - 1) // m * m


def _lane_tiling(m):
    """Lane tile (multiple of 128, capped) and padded extent for the M axis."""
    tm = min(LANE_TILE_CAP, _round_up(m, 128))
    m_pad = _round_up(m, tm)
    return tm, m_pad


# ----------------------------- Pallas kernels -----------------------------

def _mm_bias_act_kernel(w_ref, p_ref, b_ref, o_ref, *, act):
    # (Cout, K) @ (K, TM) on the MXU with f32 accumulation; bias + activation
    # fused as a VPU/EUP epilogue (lane-dense output tile).
    y = jnp.dot(w_ref[...], p_ref[...], preferred_element_type=jnp.float32)
    y = y + b_ref[...]
    if act == "leaky_relu":
        y = jnp.where(y >= 0.0, y, LEAK * y)
    elif act == "sigmoid":
        y = 1.0 / (1.0 + jnp.exp(-y))
    o_ref[...] = y


def _mm_stats_kernel(w_ref, p_ref, o_ref, sum_ref, sq_ref):
    # Conv matmul + per-channel sum / sum-of-squares accumulators (for BN).
    # sum_ref / sq_ref use a constant output index_map -> resident accumulators.
    i = pl.program_id(0)

    @pl.when(i == 0)
    def _():
        sum_ref[...] = jnp.zeros_like(sum_ref)
        sq_ref[...] = jnp.zeros_like(sq_ref)

    y = jnp.dot(w_ref[...], p_ref[...], preferred_element_type=jnp.float32)
    o_ref[...] = y
    sum_ref[...] += jnp.sum(y, axis=1, keepdims=True)
    sq_ref[...] += jnp.sum(y * y, axis=1, keepdims=True)


def _affine_lrelu_kernel(x_ref, s_ref, t_ref, o_ref):
    # Per-channel BN affine (channels on sublanes, lane-broadcast) + LeakyReLU.
    y = x_ref[...] * s_ref[...] + t_ref[...]
    o_ref[...] = jnp.where(y >= 0.0, y, LEAK * y)


# ------------------------------ Kernel wrappers ----------------------------

def _mm_bias_act(w_mat, p_T, bias, act):
    """act(w_mat @ p_T + bias) -> (Nout, M) lane-dense, tiled over M."""
    n_out, k = w_mat.shape
    m = p_T.shape[1]
    tm, m_pad = _lane_tiling(m)
    p_pad = jnp.pad(p_T, ((0, 0), (0, m_pad - m))).astype(jnp.bfloat16)
    w_bf = w_mat.astype(jnp.bfloat16)
    b2 = bias.reshape(n_out, 1).astype(jnp.float32)
    kern = functools.partial(_mm_bias_act_kernel, act=act)
    out = pl.pallas_call(
        kern,
        out_shape=jax.ShapeDtypeStruct((n_out, m_pad), jnp.float32),
        grid=(m_pad // tm,),
        in_specs=[
            pl.BlockSpec((n_out, k), lambda i: (0, 0)),
            pl.BlockSpec((k, tm), lambda i: (0, i)),
            pl.BlockSpec((n_out, 1), lambda i: (0, 0)),
        ],
        out_specs=pl.BlockSpec((n_out, tm), lambda i: (0, i)),
        compiler_params=pltpu.CompilerParams(
            dimension_semantics=("parallel",)),
    )(w_bf, p_pad, b2)
    return out[:, :m]


def _mm_with_stats(w_mat, p_T):
    """w_mat @ p_T plus per-channel sum / sumsq accumulated in-kernel."""
    n_out, k = w_mat.shape
    m = p_T.shape[1]
    tm, m_pad = _lane_tiling(m)
    p_pad = jnp.pad(p_T, ((0, 0), (0, m_pad - m))).astype(jnp.bfloat16)
    w_bf = w_mat.astype(jnp.bfloat16)
    out, csum, csq = pl.pallas_call(
        _mm_stats_kernel,
        out_shape=(jax.ShapeDtypeStruct((n_out, m_pad), jnp.float32),
                   jax.ShapeDtypeStruct((n_out, 1), jnp.float32),
                   jax.ShapeDtypeStruct((n_out, 1), jnp.float32)),
        grid=(m_pad // tm,),
        in_specs=[
            pl.BlockSpec((n_out, k), lambda i: (0, 0)),
            pl.BlockSpec((k, tm), lambda i: (0, i)),
        ],
        out_specs=(pl.BlockSpec((n_out, tm), lambda i: (0, i)),
                   pl.BlockSpec((n_out, 1), lambda i: (0, 0)),
                   pl.BlockSpec((n_out, 1), lambda i: (0, 0))),
        compiler_params=pltpu.CompilerParams(
            dimension_semantics=("arbitrary",)),   # accumulator outputs
    )(w_bf, p_pad)
    return out, csum[:, 0], csq[:, 0]


def _affine_lrelu(x_T, scale, shift):
    """y = leaky_relu(x * scale + shift), x_T:(C, M_pad) lane-dense, tiled."""
    n_out, m_pad = x_T.shape
    tm = min(LANE_TILE_CAP, m_pad)
    s2 = scale.reshape(n_out, 1).astype(jnp.float32)
    t2 = shift.reshape(n_out, 1).astype(jnp.float32)
    return pl.pallas_call(
        _affine_lrelu_kernel,
        out_shape=jax.ShapeDtypeStruct((n_out, m_pad), jnp.float32),
        grid=(m_pad // tm,),
        in_specs=[
            pl.BlockSpec((n_out, tm), lambda i: (0, i)),
            pl.BlockSpec((n_out, 1), lambda i: (0, 0)),
            pl.BlockSpec((n_out, 1), lambda i: (0, 0)),
        ],
        out_specs=pl.BlockSpec((n_out, tm), lambda i: (0, i)),
        compiler_params=pltpu.CompilerParams(
            dimension_semantics=("parallel",)),
    )(x_T, s2, t2)


# ------------------------------ Layer helpers ------------------------------

def _im2col_T(x_nchw, k, stride, padding):
    """Patches, transposed: (Cin*kH*kW, B*OH*OW); K ordered (cin, kh, kw)."""
    # TODO(synk): move this gather into the kernel pipeline (memory_space=pl.ANY
    # + per-(kh,kw) DMA / sliding-window index_map) to avoid materializing the
    # kH*kW-expanded patches array in HBM.
    B, C, H, W = x_nchw.shape
    OH = (H + 2 * padding - k) // stride + 1
    OW = (W + 2 * padding - k) // stride + 1
    xp = jnp.pad(x_nchw, ((0, 0), (0, 0), (padding, padding), (padding, padding)))
    cols = []
    for kh in range(k):
        for kw in range(k):
            cols.append(xp[:, :, kh:kh + stride * (OH - 1) + 1:stride,
                               kw:kw + stride * (OW - 1) + 1:stride])
    p = jnp.stack(cols, axis=2)                          # (B, C, k*k, OH, OW)
    p = p.transpose(1, 2, 0, 3, 4).reshape(C * k * k, B * OH * OW)
    return p, OH, OW


def conv2d_lrelu(x_nchw, w, b, *, stride=2, padding=2):
    """Conv2d(k=5,s=2,p=2) + bias + LeakyReLU(0.2), fused lane-dense matmul."""
    B = x_nchw.shape[0]
    cout, cin, kh, kw = w.shape
    p_T, OH, OW = _im2col_T(x_nchw, kh, stride, padding)
    w_mat = w.reshape(cout, cin * kh * kw)
    out = _mm_bias_act(w_mat, p_T, b, act="leaky_relu")   # (Cout, B*OH*OW)
    return out.reshape(cout, B, OH, OW).transpose(1, 0, 2, 3)


def conv2d_bn_lrelu(x_nchw, w, gamma, beta, *, stride=2, padding=2, eps=1e-5):
    """Conv2d + training-mode BatchNorm2d + LeakyReLU(0.2).

    The conv bias is omitted: BN's mean subtraction cancels it exactly, and
    skipping it keeps zero-padded M columns at exactly 0 so the in-kernel
    sum / sumsq accumulators give exact statistics over the real elements.
    """
    B = x_nchw.shape[0]
    cout, cin, kh, kw = w.shape
    p_T, OH, OW = _im2col_T(x_nchw, kh, stride, padding)
    m = B * OH * OW
    w_mat = w.reshape(cout, cin * kh * kw)
    y_T, csum, csq = _mm_with_stats(w_mat, p_T)           # (Cout, M_pad), (Cout,)x2
    mean = csum / m
    var = jnp.maximum(csq / m - mean * mean, 0.0)         # biased (training-mode)
    scale = gamma * jax.lax.rsqrt(var + eps)
    shift = beta - mean * scale
    y_T = _affine_lrelu(y_T, scale, shift)                # padded cols sliced off
    return y_T[:, :m].reshape(cout, B, OH, OW).transpose(1, 0, 2, 3)


def linear(x_2d, w, b, act="none"):
    """PyTorch Linear (x @ w.T + b), computed lane-dense as w @ x.T."""
    out_T = _mm_bias_act(w, x_2d.T, b, act=act)           # (Nout, B)
    return out_T.T


# ---------------------------- Full discriminator ---------------------------

def condigan_discriminator_forward(params, x, condi_x, *, n_layer=3):
    """CondiGAN_Discriminator.forward (condition=True)."""
    def cnn_stack(inp, pfx):
        # forward applies the conv list in reverse index order:
        # layer n_layer-1 (no BN), then n_layer-2 ... 0 (each with BN).
        h = conv2d_lrelu(inp,
                         params[f"{pfx}conv{n_layer - 1}_w"],
                         params[f"{pfx}conv{n_layer - 1}_b"])
        for idx in range(n_layer - 2, -1, -1):
            h = conv2d_bn_lrelu(h,
                                params[f"{pfx}conv{idx}_w"],
                                params[f"{pfx}bn{idx}_g"],
                                params[f"{pfx}bn{idx}_b"])
        return h

    h = cnn_stack(x, "")
    B = h.shape[0]
    feat = h.reshape(B, -1)                               # (B, featmap_dim*4*4)

    hc = cnn_stack(condi_x, "c_")
    cfeat = hc.reshape(B, -1)                             # (B, condi_featmap_dim*4*4)
    cfeat = linear(cfeat, params["fc_c_w"], params["fc_c_b"], act="none")

    feat = jnp.concatenate([feat, cfeat], axis=1)
    return linear(feat, params["fc_w"], params["fc_b"], act="sigmoid")  # (B, 1)


def init_params(key, featmap_dim, condi_featmap_dim, n_channel, n_condition,
                n_layer=3):
    """Deterministic synthetic parameters (shapes match the nn.Module)."""
    keys = iter(jax.random.split(key, 64))

    def nrm(shape, s=0.05):
        return (s * jax.random.normal(next(keys), shape)).astype(jnp.float32)

    params = {}

    def add_cnn(pfx, fdim):
        for layer in range(n_layer):
            cin = n_channel if layer == n_layer - 1 else fdim // (2 ** (layer + 1))
            cout = fdim // (2 ** layer)
            params[f"{pfx}conv{layer}_w"] = nrm((cout, cin, 5, 5))
            # Biases exist on every Conv2d; for BN'd layers they are exactly
            # cancelled by the BN mean subtraction and are not used in compute.
            params[f"{pfx}conv{layer}_b"] = nrm((cout,))
            if layer != n_layer - 1:
                params[f"{pfx}bn{layer}_g"] = 1.0 + nrm((cout,), 0.1)
                params[f"{pfx}bn{layer}_b"] = nrm((cout,), 0.1)

    add_cnn("", featmap_dim)
    add_cnn("c_", condi_featmap_dim)
    params["fc_c_w"] = nrm((n_condition, condi_featmap_dim * 4 * 4))
    params["fc_c_b"] = nrm((n_condition,))
    params["fc_w"] = nrm((1, featmap_dim * 4 * 4 + n_condition))
    params["fc_b"] = nrm((1,))
    return params


if __name__ == "__main__":
    # Small config consistent with the module: 3 layers, 5x5 s=2 p=2 convs,
    # 28x28 input -> 14 -> 7 -> 4 spatial, flattened to featmap_dim*4*4.
    FEATMAP_DIM = 32
    CONDI_FEATMAP_DIM = 32
    N_CHANNEL = 1
    N_CONDITION = 16
    N_LAYER = 3
    BATCH = 2
    H = W = 28

    key = jax.random.PRNGKey(0)
    kp, kx, kc = jax.random.split(key, 3)
    params = init_params(kp, FEATMAP_DIM, CONDI_FEATMAP_DIM, N_CHANNEL,
                         N_CONDITION, N_LAYER)
    x = jax.random.normal(kx, (BATCH, N_CHANNEL, H, W), dtype=jnp.float32)
    condi_x = jax.random.normal(kc, (BATCH, N_CHANNEL, H, W), dtype=jnp.float32)

    fwd = jax.jit(functools.partial(condigan_discriminator_forward,
                                    n_layer=N_LAYER))
    out = jax.block_until_ready(fwd(params, x, condi_x))

    assert out.shape == (BATCH, 1), out.shape
    assert bool(jnp.all(jnp.isfinite(out)))
    assert bool(jnp.all((out >= 0.0) & (out <= 1.0)))
    print("KERNEL_OK")
</pallas_src>

<mosaic_0001>
module attributes {stable_mosaic.version = 11 : i64} {
  func.func @_mm_bias_act_kernel(%arg0: i32, %arg1: memref<8x25xbf16, #tpu.memory_space<vmem>>, %arg2: memref<25x256xbf16, #tpu.memory_space<vmem>>, %arg3: memref<8x1xf32, #tpu.memory_space<vmem>>, %arg4: memref<8x256xf32, #tpu.memory_space<vmem>>) attributes {dimension_semantics = [#tpu.dimension_semantics<parallel>], iteration_bounds = array<i64: 2>, scalar_prefetch = 0 : i64, scratch_operands = 0 : i64, tpu.core_type = #tpu.core_type<tc>, window_params = [{pipeline_mode = #tpu.pipeline_mode<synchronous>, transform_indices = @transform_0, window_bounds = array<i64: 8, 25>}, {transform_indices = @transform_1, window_bounds = array<i64: 25, 256>}, {pipeline_mode = #tpu.pipeline_mode<synchronous>, transform_indices = @transform_2, window_bounds = array<i64: 8, 1>}, {transform_indices = @transform_3, window_bounds = array<i64: 8, 256>}]} {
    %c0 = arith.constant 0 : index
    %c0_0 = arith.constant 0 : index
    %0 = vector.load %arg1[%c0, %c0_0] : memref<8x25xbf16, #tpu.memory_space<vmem>>, vector<8x25xbf16>
    %c0_1 = arith.constant 0 : index
    %c0_2 = arith.constant 0 : index
    %1 = vector.load %arg2[%c0_1, %c0_2] : memref<25x256xbf16, #tpu.memory_space<vmem>>, vector<25x256xbf16>
    %cst = arith.constant dense<0.000000e+00> : vector<8x256xf32>
    %2 = tpu.matmul %0, %1, %cst {dimension_numbers = #tpu.dot_dimension_numbers<[1], [0], [0], [1], [0, 0, 1, 1], [], []>} : vector<8x25xbf16>, vector<25x256xbf16>, vector<8x256xf32> -> vector<8x256xf32>
    %c0_3 = arith.constant 0 : index
    %c0_4 = arith.constant 0 : index
    %3 = vector.load %arg3[%c0_3, %c0_4] : memref<8x1xf32, #tpu.memory_space<vmem>>, vector<8x1xf32>
    %4 = vector.broadcast %3 : vector<8x1xf32> to vector<8x256xf32>
    %5 = arith.addf %2, %4 : vector<8x256xf32>
    %cst_5 = arith.constant 0.000000e+00 : f32
    %6 = vector.broadcast %cst_5 : f32 to vector<8x256xf32>
    %7 = arith.cmpf oge, %5, %6 : vector<8x256xf32>
    %cst_6 = arith.constant 2.000000e-01 : f32
    %8 = vector.broadcast %cst_6 : f32 to vector<8x256xf32>
    %9 = arith.mulf %8, %5 : vector<8x256xf32>
    %10 = arith.select %7, %5, %9 : vector<8x256xi1>, vector<8x256xf32>
    %c0_7 = arith.constant 0 : index
    %c0_8 = arith.constant 0 : index
    %11 = vector.load %arg4[%c0_7, %c0_8] : memref<8x256xf32, #tpu.memory_space<vmem>>, vector<8x256xf32>
    tpu.vector_store %arg4[%c0_7, %c0_8], %10 {strides = array<i32>} : memref<8x256xf32, #tpu.memory_space<vmem>>, vector<8x256xf32>,
    return
  }
  func.func @transform_0(%arg0: i32) -> (i32, i32) {
    %c0_i32 = arith.constant 0 : i32
    %c0_i32_0 = arith.constant 0 : i32
    %c0_i32_1 = arith.constant 0 : i32
    return %c0_i32, %c0_i32_0 : i32, i32
  }
  func.func @transform_1(%arg0: i32) -> (i32, i32) {
    %c0_i32 = arith.constant 0 : i32
    %c0_i32_0 = arith.constant 0 : i32
    return %c0_i32, %arg0 : i32, i32
  }
  func.func @transform_2(%arg0: i32) -> (i32, i32) {
    %c0_i32 = arith.constant 0 : i32
    %c0_i32_0 = arith.constant 0 : i32
    %c0_i32_1 = arith.constant 0 : i32
    return %c0_i32, %c0_i32_0 : i32, i32
  }
  func.func @transform_3(%arg0: i32) -> (i32, i32) {
    %c0_i32 = arith.constant 0 : i32
    %c0_i32_0 = arith.constant 0 : i32
    return %c0_i32, %arg0 : i32, i32
  }
}

module attributes {stable_mosaic.version = 11 : i64} {
  func.func @_mm_stats_kernel(%arg0: i32, %arg1: memref<16x200xbf16, #tpu.memory_space<vmem>>, %arg2: memref<200x128xbf16, #tpu.memory_space<vmem>>, %arg3: memref<16x128xf32, #tpu.memory_space<vmem>>, %arg4: memref<16x1xf32, #tpu.memory_space<vmem>>, %arg5: memref<16x1xf32, #tpu.memory_space<vmem>>) attributes {dimension_semantics = [#tpu.dimension_semantics<arbitrary>], iteration_bounds = array<i64: 1>, scalar_prefetch = 0 : i64, scratch_operands = 0 : i64, tpu.core_type = #tpu.core_type<tc>, window_params = [{pipeline_mode = #tpu.pipeline_mode<synchronous>, transform_indices = @transform_0, window_bounds = array<i64: 16, 200>}, {transform_indices = @transform_1, window_bounds = array<i64: 200, 128>}, {transform_indices = @transform_2, window_bounds = array<i64: 16, 128>}, {pipeline_mode = #tpu.pipeline_mode<synchronous>, transform_indices = @transform_3, window_bounds = array<i64: 16, 1>}, {pipeline_mode = #tpu.pipeline_mode<synchronous>, transform_indices = @transform_4, window_bounds = array<i64: 16, 1>}]} {
    %c0_i32 = arith.constant 0 : i32
    %0 = arith.cmpi eq, %arg0, %c0_i32 : i32
    %1 = arith.extui %0 : i1 to i32
    %c0_i32_0 = arith.constant 0 : i32
    %2 = arith.cmpi ne, %1, %c0_i32_0 : i32
    scf.if %2 {
      %cst_16 = arith.constant 0.000000e+00 : f32
      %18 = vector.broadcast %cst_16 : f32 to vector<16x1xf32>
      %c0_17 = arith.constant 0 : index
      %c0_18 = arith.constant 0 : index
      %19 = vector.load %arg4[%c0_17, %c0_18] : memref<16x1xf32, #tpu.memory_space<vmem>>, vector<16x1xf32>
      tpu.vector_store %arg4[%c0_17, %c0_18], %18 {strides = array<i32>} : memref<16x1xf32, #tpu.memory_space<vmem>>, vector<16x1xf32>,
      %cst_19 = arith.constant 0.000000e+00 : f32
      %20 = vector.broadcast %cst_19 : f32 to vector<16x1xf32>
      %c0_20 = arith.constant 0 : index
      %c0_21 = arith.constant 0 : index
      %21 = vector.load %arg5[%c0_20, %c0_21] : memref<16x1xf32, #tpu.memory_space<vmem>>, vector<16x1xf32>
      tpu.vector_store %arg5[%c0_20, %c0_21], %20 {strides = array<i32>} : memref<16x1xf32, #tpu.memory_space<vmem>>, vector<16x1xf32>,
    } else {
    }
    %c0 = arith.constant 0 : index
    %c0_1 = arith.constant 0 : index
    %3 = vector.load %arg1[%c0, %c0_1] : memref<16x200xbf16, #tpu.memory_space<vmem>>, vector<16x200xbf16>
    %c0_2 = arith.constant 0 : index
    %c0_3 = arith.constant 0 : index
    %4 = vector.load %arg2[%c0_2, %c0_3] : memref<200x128xbf16, #tpu.memory_space<vmem>>, vector<200x128xbf16>
    %cst = arith.constant dense<0.000000e+00> : vector<16x128xf32>
    %5 = tpu.matmul %3, %4, %cst {dimension_numbers = #tpu.dot_dimension_numbers<[1], [0], [0], [1], [0, 0, 1, 1], [], []>} : vector<16x200xbf16>, vector<200x128xbf16>, vector<16x128xf32> -> vector<16x128xf32>
    %c0_4 = arith.constant 0 : index
    %c0_5 = arith.constant 0 : index
    %6 = vector.load %arg3[%c0_4, %c0_5] : memref<16x128xf32, #tpu.memory_space<vmem>>, vector<16x128xf32>
    tpu.vector_store %arg3[%c0_4, %c0_5], %5 {strides = array<i32>} : memref<16x128xf32, #tpu.memory_space<vmem>>, vector<16x128xf32>,
    %c0_6 = arith.constant 0 : index
    %c0_7 = arith.constant 0 : index
    %7 = vector.load %arg4[%c0_6, %c0_7] : memref<16x1xf32, #tpu.memory_space<vmem>>, vector<16x1xf32>
    %cst_8 = arith.constant dense<0.000000e+00> : vector<16xf32>
    %8 = vector.multi_reduction <add>, %5, %cst_8 [1] : vector<16x128xf32> to vector<16xf32>
    %9 = vector.shape_cast %8 : vector<16xf32> to vector<16x1xf32>
    %10 = arith.addf %7, %9 : vector<16x1xf32>
    %c0_9 = arith.constant 0 : index
    %c0_10 = arith.constant 0 : index
    %11 = vector.load %arg4[%c0_9, %c0_10] : memref<16x1xf32, #tpu.memory_space<vmem>>, vector<16x1xf32>
    tpu.vector_store %arg4[%c0_9, %c0_10], %10 {strides = array<i32>} : memref<16x1xf32, #tpu.memory_space<vmem>>, vector<16x1xf32>,
    %c0_11 = arith.constant 0 : index
    %c0_12 = arith.constant 0 : index
    %12 = vector.load %arg5[%c0_11, %c0_12] : memref<16x1xf32, #tpu.memory_space<vmem>>, vector<16x1xf32>
    %13 = arith.mulf %5, %5 : vector<16x128xf32>
    %cst_13 = arith.constant dense<0.000000e+00> : vector<16xf32>
    %14 = vector.multi_reduction <add>, %13, %cst_13 [1] : vector<16x128xf32> to vector<16xf32>
    %15 = vector.shape_cast %14 : vector<16xf32> to vector<16x1xf32>
    %16 = arith.addf %12, %15 : vector<16x1xf32>
    %c0_14 = arith.constant 0 : index
    %c0_15 = arith.constant 0 : index
    %17 = vector.load %arg5[%c0_14, %c0_15] : memref<16x1xf32, #tpu.memory_space<vmem>>, vector<16x1xf32>
    tpu.vector_store %arg5[%c0_14, %c0_15], %16 {strides = array<i32>} : memref<16x1xf32, #tpu.memory_space<vmem>>, vector<16x1xf32>,
    return
  }
  func.func @transform_0(%arg0: i32) -> (i32, i32) {
    %c0_i32 = arith.constant 0 : i32
    %c0_i32_0 = arith.constant 0 : i32
    %c0_i32_1 = arith.constant 0 : i32
    return %c0_i32, %c0_i32_0 : i32, i32
  }
  func.func @transform_1(%arg0: i32) -> (i32, i32) {
    %c0_i32 = arith.constant 0 : i32
    %c0_i32_0 = arith.constant 0 : i32
    return %c0_i32, %arg0 : i32, i32
  }
  func.func @transform_2(%arg0: i32) -> (i32, i32) {
    %c0_i32 = arith.constant 0 : i32
    %c0_i32_0 = arith.constant 0 : i32
    return %c0_i32, %arg0 : i32, i32
  }
  func.func @transform_3(%arg0: i32) -> (i32, i32) {
    %c0_i32 = arith.constant 0 : i32
    %c0_i32_0 = arith.constant 0 : i32
    %c0_i32_1 = arith.constant 0 : i32
    return %c0_i32, %c0_i32_0 : i32, i32
  }
  func.func @transform_4(%arg0: i32) -> (i32, i32) {
    %c0_i32 = arith.constant 0 : i32
    %c0_i32_0 = arith.constant 0 : i32
    %c0_i32_1 = arith.constant 0 : i32
    return %c0_i32, %c0_i32_0 : i32, i32
  }
}

module attributes {stable_mosaic.version = 11 : i64} {
  func.func @_affine_lrelu_kernel(%arg0: i32, %arg1: memref<16x128xf32, #tpu.memory_space<vmem>>, %arg2: memref<16x1xf32, #tpu.memory_space<vmem>>, %arg3: memref<16x1xf32, #tpu.memory_space<vmem>>, %arg4: memref<16x128xf32, #tpu.memory_space<vmem>>) attributes {dimension_semantics = [#tpu.dimension_semantics<parallel>], iteration_bounds = array<i64: 1>, scalar_prefetch = 0 : i64, scratch_operands = 0 : i64, tpu.core_type = #tpu.core_type<tc>, window_params = [{transform_indices = @transform_0, window_bounds = array<i64: 16, 128>}, {pipeline_mode = #tpu.pipeline_mode<synchronous>, transform_indices = @transform_1, window_bounds = array<i64: 16, 1>}, {pipeline_mode = #tpu.pipeline_mode<synchronous>, transform_indices = @transform_2, window_bounds = array<i64: 16, 1>}, {transform_indices = @transform_3, window_bounds = array<i64: 16, 128>}]} {
    %c0 = arith.constant 0 : index
    %c0_0 = arith.constant 0 : index
    %0 = vector.load %arg1[%c0, %c0_0] : memref<16x128xf32, #tpu.memory_space<vmem>>, vector<16x128xf32>
    %c0_1 = arith.constant 0 : index
    %c0_2 = arith.constant 0 : index
    %1 = vector.load %arg2[%c0_1, %c0_2] : memref<16x1xf32, #tpu.memory_space<vmem>>, vector<16x1xf32>
    %2 = vector.broadcast %1 : vector<16x1xf32> to vector<16x128xf32>
    %3 = arith.mulf %0, %2 : vector<16x128xf32>
    %c0_3 = arith.constant 0 : index
    %c0_4 = arith.constant 0 : index
    %4 = vector.load %arg3[%c0_3, %c0_4] : memref<16x1xf32, #tpu.memory_space<vmem>>, vector<16x1xf32>
    %5 = vector.broadcast %4 : vector<16x1xf32> to vector<16x128xf32>
    %6 = arith.addf %3, %5 : vector<16x128xf32>
    %cst = arith.constant 0.000000e+00 : f32
    %7 = vector.broadcast %cst : f32 to vector<16x128xf32>
    %8 = arith.cmpf oge, %6, %7 : vector<16x128xf32>
    %cst_5 = arith.constant 2.000000e-01 : f32
    %9 = vector.broadcast %cst_5 : f32 to vector<16x128xf32>
    %10 = arith.mulf %9, %6 : vector<16x128xf32>
    %11 = arith.select %8, %6, %10 : vector<16x128xi1>, vector<16x128xf32>
    %c0_6 = arith.constant 0 : index
    %c0_7 = arith.constant 0 : index
    %12 = vector.load %arg4[%c0_6, %c0_7] : memref<16x128xf32, #tpu.memory_space<vmem>>, vector<16x128xf32>
    tpu.vector_store %arg4[%c0_6, %c0_7], %11 {strides = array<i32>} : memref<16x128xf32, #tpu.memory_space<vmem>>, vector<16x128xf32>,
    return
  }
  func.func @transform_0(%arg0: i32) -> (i32, i32) {
    %c0_i32 = arith.constant 0 : i32
    %c0_i32_0 = arith.constant 0 : i32
    return %c0_i32, %arg0 : i32, i32
  }
  func.func @transform_1(%arg0: i32) -> (i32, i32) {
    %c0_i32 = arith.constant 0 : i32
    %c0_i32_0 = arith.constant 0 : i32
    %c0_i32_1 = arith.constant 0 : i32
    return %c0_i32, %c0_i32_0 : i32, i32
  }
  func.func @transform_2(%arg0: i32) -> (i32, i32) {
    %c0_i32 = arith.constant 0 : i32
    %c0_i32_0 = arith.constant 0 : i32
    %c0_i32_1 = arith.constant 0 : i32
    return %c0_i32, %c0_i32_0 : i32, i32
  }
  func.func @transform_3(%arg0: i32) -> (i32, i32) {
    %c0_i32 = arith.constant 0 : i32
    %c0_i32_0 = arith.constant 0 : i32
    return %c0_i32, %arg0 : i32, i32
  }
}

module attributes {stable_mosaic.version = 11 : i64} {
  func.func @_mm_stats_kernel(%arg0: i32, %arg1: memref<32x400xbf16, #tpu.memory_space<vmem>>, %arg2: memref<400x128xbf16, #tpu.memory_space<vmem>>, %arg3: memref<32x128xf32, #tpu.memory_space<vmem>>, %arg4: memref<32x1xf32, #tpu.memory_space<vmem>>, %arg5: memref<32x1xf32, #tpu.memory_space<vmem>>) attributes {dimension_semantics = [#tpu.dimension_semantics<arbitrary>], iteration_bounds = array<i64: 1>, scalar_prefetch = 0 : i64, scratch_operands = 0 : i64, tpu.core_type = #tpu.core_type<tc>, window_params = [{pipeline_mode = #tpu.pipeline_mode<synchronous>, transform_indices = @transform_0, window_bounds = array<i64: 32, 400>}, {transform_indices = @transform_1, window_bounds = array<i64: 400, 128>}, {transform_indices = @transform_2, window_bounds = array<i64: 32, 128>}, {pipeline_mode = #tpu.pipeline_mode<synchronous>, transform_indices = @transform_3, window_bounds = array<i64: 32, 1>}, {pipeline_mode = #tpu.pipeline_mode<synchronous>, transform_indices = @transform_4, window_bounds = array<i64: 32, 1>}]} {
    %c0_i32 = arith.constant 0 : i32
    %0 = arith.cmpi eq, %arg0, %c0_i32 : i32
    %1 = arith.extui %0 : i1 to i32
    %c0_i32_0 = arith.constant 0 : i32
    %2 = arith.cmpi ne, %1, %c0_i32_0 : i32
    scf.if %2 {
      %cst_16 = arith.constant 0.000000e+00 : f32
      %18 = vector.broadcast %cst_16 : f32 to vector<32x1xf32>
      %c0_17 = arith.constant 0 : index
      %c0_18 = arith.constant 0 : index
      %19 = vector.load %arg4[%c0_17, %c0_18] : memref<32x1xf32, #tpu.memory_space<vmem>>, vector<32x1xf32>
      tpu.vector_store %arg4[%c0_17, %c0_18], %18 {strides = array<i32>} : memref<32x1xf32, #tpu.memory_space<vmem>>, vector<32x1xf32>,
      %cst_19 = arith.constant 0.000000e+00 : f32
      %20 = vector.broadcast %cst_19 : f32 to vector<32x1xf32>
      %c0_20 = arith.constant 0 : index
      %c0_21 = arith.constant 0 : index
      %21 = vector.load %arg5[%c0_20, %c0_21] : memref<32x1xf32, #tpu.memory_space<vmem>>, vector<32x1xf32>
      tpu.vector_store %arg5[%c0_20, %c0_21], %20 {strides = array<i32>} : memref<32x1xf32, #tpu.memory_space<vmem>>, vector<32x1xf32>,
    } else {
    }
    %c0 = arith.constant 0 : index
    %c0_1 = arith.constant 0 : index
    %3 = vector.load %arg1[%c0, %c0_1] : memref<32x400xbf16, #tpu.memory_space<vmem>>, vector<32x400xbf16>
    %c0_2 = arith.constant 0 : index
    %c0_3 = arith.constant 0 : index
    %4 = vector.load %arg2[%c0_2, %c0_3] : memref<400x128xbf16, #tpu.memory_space<vmem>>, vector<400x128xbf16>
    %cst = arith.constant dense<0.000000e+00> : vector<32x128xf32>
    %5 = tpu.matmul %3, %4, %cst {dimension_numbers = #tpu.dot_dimension_numbers<[1], [0], [0], [1], [0, 0, 1, 1], [], []>} : vector<32x400xbf16>, vector<400x128xbf16>, vector<32x128xf32> -> vector<32x128xf32>
    %c0_4 = arith.constant 0 : index
    %c0_5 = arith.constant 0 : index
    %6 = vector.load %arg3[%c0_4, %c0_5] : memref<32x128xf32, #tpu.memory_space<vmem>>, vector<32x128xf32>
    tpu.vector_store %arg3[%c0_4, %c0_5], %5 {strides = array<i32>} : memref<32x128xf32, #tpu.memory_space<vmem>>, vector<32x128xf32>,
    %c0_6 = arith.constant 0 : index
    %c0_7 = arith.constant 0 : index
    %7 = vector.load %arg4[%c0_6, %c0_7] : memref<32x1xf32, #tpu.memory_space<vmem>>, vector<32x1xf32>
    %cst_8 = arith.constant dense<0.000000e+00> : vector<32xf32>
    %8 = vector.multi_reduction <add>, %5, %cst_8 [1] : vector<32x128xf32> to vector<32xf32>
    %9 = vector.shape_cast %8 : vector<32xf32> to vector<32x1xf32>
    %10 = arith.addf %7, %9 : vector<32x1xf32>
    %c0_9 = arith.constant 0 : index
    %c0_10 = arith.constant 0 : index
    %11 = vector.load %arg4[%c0_9, %c0_10] : memref<32x1xf32, #tpu.memory_space<vmem>>, vector<32x1xf32>
    tpu.vector_store %arg4[%c0_9, %c0_10], %10 {strides = array<i32>} : memref<32x1xf32, #tpu.memory_space<vmem>>, vector<32x1xf32>,
    %c0_11 = arith.constant 0 : index
    %c0_12 = arith.constant 0 : index
    %12 = vector.load %arg5[%c0_11, %c0_12] : memref<32x1xf32, #tpu.memory_space<vmem>>, vector<32x1xf32>
    %13 = arith.mulf %5, %5 : vector<32x128xf32>
    %cst_13 = arith.constant dense<0.000000e+00> : vector<32xf32>
    %14 = vector.multi_reduction <add>, %13, %cst_13 [1] : vector<32x128xf32> to vector<32xf32>
    %15 = vector.shape_cast %14 : vector<32xf32> to vector<32x1xf32>
    %16 = arith.addf %12, %15 : vector<32x1xf32>
    %c0_14 = arith.constant 0 : index
    %c0_15 = arith.constant 0 : index
    %17 = vector.load %arg5[%c0_14, %c0_15] : memref<32x1xf32, #tpu.memory_space<vmem>>, vector<32x1xf32>
    tpu.vector_store %arg5[%c0_14, %c0_15], %16 {strides = array<i32>} : memref<32x1xf32, #tpu.memory_space<vmem>>, vector<32x1xf32>,
    return
  }
  func.func @transform_0(%arg0: i32) -> (i32, i32) {
    %c0_i32 = arith.constant 0 : i32
    %c0_i32_0 = arith.constant 0 : i32
    %c0_i32_1 = arith.constant 0 : i32
    return %c0_i32, %c0_i32_0 : i32, i32
  }
  func.func @transform_1(%arg0: i32) -> (i32, i32) {
    %c0_i32 = arith.constant 0 : i32
    %c0_i32_0 = arith.constant 0 : i32
    return %c0_i32, %arg0 : i32, i32
  }
  func.func @transform_2(%arg0: i32) -> (i32, i32) {
    %c0_i32 = arith.constant 0 : i32
    %c0_i32_0 = arith.constant 0 : i32
    return %c0_i32, %arg0 : i32, i32
  }
  func.func @transform_3(%arg0: i32) -> (i32, i32) {
    %c0_i32 = arith.constant 0 : i32
    %c0_i32_0 = arith.constant 0 : i32
    %c0_i32_1 = arith.constant 0 : i32
    return %c0_i32, %c0_i32_0 : i32, i32
  }
  func.func @transform_4(%arg0: i32) -> (i32, i32) {
    %c0_i32 = arith.constant 0 : i32
    %c0_i32_0 = arith.constant 0 : i32
    %c0_i32_1 = arith.constant 0 : i32
    return %c0_i32, %c0_i32_0 : i32, i32
  }
}

module attributes {stable_mosaic.version = 11 : i64} {
  func.func @_affine_lrelu_kernel(%arg0: i32, %arg1: memref<32x128xf32, #tpu.memory_space<vmem>>, %arg2: memref<32x1xf32, #tpu.memory_space<vmem>>, %arg3: memref<32x1xf32, #tpu.memory_space<vmem>>, %arg4: memref<32x128xf32, #tpu.memory_space<vmem>>) attributes {dimension_semantics = [#tpu.dimension_semantics<parallel>], iteration_bounds = array<i64: 1>, scalar_prefetch = 0 : i64, scratch_operands = 0 : i64, tpu.core_type = #tpu.core_type<tc>, window_params = [{transform_indices = @transform_0, window_bounds = array<i64: 32, 128>}, {pipeline_mode = #tpu.pipeline_mode<synchronous>, transform_indices = @transform_1, window_bounds = array<i64: 32, 1>}, {pipeline_mode = #tpu.pipeline_mode<synchronous>, transform_indices = @transform_2, window_bounds = array<i64: 32, 1>}, {transform_indices = @transform_3, window_bounds = array<i64: 32, 128>}]} {
    %c0 = arith.constant 0 : index
    %c0_0 = arith.constant 0 : index
    %0 = vector.load %arg1[%c0, %c0_0] : memref<32x128xf32, #tpu.memory_space<vmem>>, vector<32x128xf32>
    %c0_1 = arith.constant 0 : index
    %c0_2 = arith.constant 0 : index
    %1 = vector.load %arg2[%c0_1, %c0_2] : memref<32x1xf32, #tpu.memory_space<vmem>>, vector<32x1xf32>
    %2 = vector.broadcast %1 : vector<32x1xf32> to vector<32x128xf32>
    %3 = arith.mulf %0, %2 : vector<32x128xf32>
    %c0_3 = arith.constant 0 : index
    %c0_4 = arith.constant 0 : index
    %4 = vector.load %arg3[%c0_3, %c0_4] : memref<32x1xf32, #tpu.memory_space<vmem>>, vector<32x1xf32>
    %5 = vector.broadcast %4 : vector<32x1xf32> to vector<32x128xf32>
    %6 = arith.addf %3, %5 : vector<32x128xf32>
    %cst = arith.constant 0.000000e+00 : f32
    %7 = vector.broadcast %cst : f32 to vector<32x128xf32>
    %8 = arith.cmpf oge, %6, %7 : vector<32x128xf32>
    %cst_5 = arith.constant 2.000000e-01 : f32
    %9 = vector.broadcast %cst_5 : f32 to vector<32x128xf32>
    %10 = arith.mulf %9, %6 : vector<32x128xf32>
    %11 = arith.select %8, %6, %10 : vector<32x128xi1>, vector<32x128xf32>
    %c0_6 = arith.constant 0 : index
    %c0_7 = arith.constant 0 : index
    %12 = vector.load %arg4[%c0_6, %c0_7] : memref<32x128xf32, #tpu.memory_space<vmem>>, vector<32x128xf32>
    tpu.vector_store %arg4[%c0_6, %c0_7], %11 {strides = array<i32>} : memref<32x128xf32, #tpu.memory_space<vmem>>, vector<32x128xf32>,
    return
  }
  func.func @transform_0(%arg0: i32) -> (i32, i32) {
    %c0_i32 = arith.constant 0 : i32
    %c0_i32_0 = arith.constant 0 : i32
    return %c0_i32, %arg0 : i32, i32
  }
  func.func @transform_1(%arg0: i32) -> (i32, i32) {
    %c0_i32 = arith.constant 0 : i32
    %c0_i32_0 = arith.constant 0 : i32
    %c0_i32_1 = arith.constant 0 : i32
    return %c0_i32, %c0_i32_0 : i32, i32
  }
  func.func @transform_2(%arg0: i32) -> (i32, i32) {
    %c0_i32 = arith.constant 0 : i32
    %c0_i32_0 = arith.constant 0 : i32
    %c0_i32_1 = arith.constant 0 : i32
    return %c0_i32, %c0_i32_0 : i32, i32
  }
  func.func @transform_3(%arg0: i32) -> (i32, i32) {
    %c0_i32 = arith.constant 0 : i32
    %c0_i32_0 = arith.constant 0 : i32
    return %c0_i32, %arg0 : i32, i32
  }
}

module attributes {stable_mosaic.version = 11 : i64} {
  func.func @_mm_bias_act_kernel(%arg0: i32, %arg1: memref<16x512xbf16, #tpu.memory_space<vmem>>, %arg2: memref<512x128xbf16, #tpu.memory_space<vmem>>, %arg3: memref<16x1xf32, #tpu.memory_space<vmem>>, %arg4: memref<16x128xf32, #tpu.memory_space<vmem>>) attributes {dimension_semantics = [#tpu.dimension_semantics<parallel>], iteration_bounds = array<i64: 1>, scalar_prefetch = 0 : i64, scratch_operands = 0 : i64, tpu.core_type = #tpu.core_type<tc>, window_params = [{pipeline_mode = #tpu.pipeline_mode<synchronous>, transform_indices = @transform_0, window_bounds = array<i64: 16, 512>}, {transform_indices = @transform_1, window_bounds = array<i64: 512, 128>}, {pipeline_mode = #tpu.pipeline_mode<synchronous>, transform_indices = @transform_2, window_bounds = array<i64: 16, 1>}, {transform_indices = @transform_3, window_bounds = array<i64: 16, 128>}]} {
    %c0 = arith.constant 0 : index
    %c0_0 = arith.constant 0 : index
    %0 = vector.load %arg1[%c0, %c0_0] : memref<16x512xbf16, #tpu.memory_space<vmem>>, vector<16x512xbf16>
    %c0_1 = arith.constant 0 : index
    %c0_2 = arith.constant 0 : index
    %1 = vector.load %arg2[%c0_1, %c0_2] : memref<512x128xbf16, #tpu.memory_space<vmem>>, vector<512x128xbf16>
    %cst = arith.constant dense<0.000000e+00> : vector<16x128xf32>
    %2 = tpu.matmul %0, %1, %cst {dimension_numbers = #tpu.dot_dimension_numbers<[1], [0], [0], [1], [0, 0, 1, 1], [], []>} : vector<16x512xbf16>, vector<512x128xbf16>, vector<16x128xf32> -> vector<16x128xf32>
    %c0_3 = arith.constant 0 : index
    %c0_4 = arith.constant 0 : index
    %3 = vector.load %arg3[%c0_3, %c0_4] : memref<16x1xf32, #tpu.memory_space<vmem>>, vector<16x1xf32>
    %4 = vector.broadcast %3 : vector<16x1xf32> to vector<16x128xf32>
    %5 = arith.addf %2, %4 : vector<16x128xf32>
    %c0_5 = arith.constant 0 : index
    %c0_6 = arith.constant 0 : index
    %6 = vector.load %arg4[%c0_5, %c0_6] : memref<16x128xf32, #tpu.memory_space<vmem>>, vector<16x128xf32>
    tpu.vector_store %arg4[%c0_5, %c0_6], %5 {strides = array<i32>} : memref<16x128xf32, #tpu.memory_space<vmem>>, vector<16x128xf32>,
    return
  }
  func.func @transform_0(%arg0: i32) -> (i32, i32) {
    %c0_i32 = arith.constant 0 : i32
    %c0_i32_0 = arith.constant 0 : i32
    %c0_i32_1 = arith.constant 0 : i32
    return %c0_i32, %c0_i32_0 : i32, i32
  }
  func.func @transform_1(%arg0: i32) -> (i32, i32) {
    %c0_i32 = arith.constant 0 : i32
    %c0_i32_0 = arith.constant 0 : i32
    return %c0_i32, %arg0 : i32, i32
  }
  func.func @transform_2(%arg0: i32) -> (i32, i32) {
    %c0_i32 = arith.constant 0 : i32
    %c0_i32_0 = arith.constant 0 : i32
    %c0_i32_1 = arith.constant 0 : i32
    return %c0_i32, %c0_i32_0 : i32, i32
  }
  func.func @transform_3(%arg0: i32) -> (i32, i32) {
    %c0_i32 = arith.constant 0 : i32
    %c0_i32_0 = arith.constant 0 : i32
    return %c0_i32, %arg0 : i32, i32
  }
}

module attributes {stable_mosaic.version = 11 : i64} {
  func.func @_mm_bias_act_kernel(%arg0: i32, %arg1: memref<1x528xbf16, #tpu.memory_space<vmem>>, %arg2: memref<528x128xbf16, #tpu.memory_space<vmem>>, %arg3: memref<1x1xf32, #tpu.memory_space<vmem>>, %arg4: memref<1x128xf32, #tpu.memory_space<vmem>>) attributes {dimension_semantics = [#tpu.dimension_semantics<parallel>], iteration_bounds = array<i64: 1>, scalar_prefetch = 0 : i64, scratch_operands = 0 : i64, tpu.core_type = #tpu.core_type<tc>, window_params = [{pipeline_mode = #tpu.pipeline_mode<synchronous>, transform_indices = @transform_0, window_bounds = array<i64: 1, 528>}, {transform_indices = @transform_1, window_bounds = array<i64: 528, 128>}, {pipeline_mode = #tpu.pipeline_mode<synchronous>, transform_indices = @transform_2, window_bounds = array<i64: 1, 1>}, {transform_indices = @transform_3, window_bounds = array<i64: 1, 128>}]} {
    %c0 = arith.constant 0 : index
    %c0_0 = arith.constant 0 : index
    %0 = vector.load %arg1[%c0, %c0_0] : memref<1x528xbf16, #tpu.memory_space<vmem>>, vector<1x528xbf16>
    %c0_1 = arith.constant 0 : index
    %c0_2 = arith.constant 0 : index
    %1 = vector.load %arg2[%c0_1, %c0_2] : memref<528x128xbf16, #tpu.memory_space<vmem>>, vector<528x128xbf16>
    %cst = arith.constant dense<0.000000e+00> : vector<1x128xf32>
    %2 = tpu.matmul %0, %1, %cst {dimension_numbers = #tpu.dot_dimension_numbers<[1], [0], [0], [1], [0, 0, 1, 1], [], []>} : vector<1x528xbf16>, vector<528x128xbf16>, vector<1x128xf32> -> vector<1x128xf32>
    %c0_3 = arith.constant 0 : index
    %c0_4 = arith.constant 0 : index
    %3 = vector.load %arg3[%c0_3, %c0_4] : memref<1x1xf32, #tpu.memory_space<vmem>>, vector<1x1xf32>
    %4 = vector.broadcast %3 : vector<1x1xf32> to vector<1x128xf32>
    %5 = arith.addf %2, %4 : vector<1x128xf32>
    %cst_5 = arith.constant 0.000000e+00 : f32
    %6 = vector.broadcast %cst_5 : f32 to vector<1x128xf32>
    %7 = arith.subf %6, %5 : vector<1x128xf32>
    %8 = math.exp %7 : vector<1x128xf32>
    %cst_6 = arith.constant 1.000000e+00 : f32
    %9 = vector.broadcast %cst_6 : f32 to vector<1x128xf32>
    %10 = arith.addf %9, %8 : vector<1x128xf32>
    %cst_7 = arith.constant 1.000000e+00 : f32
    %11 = vector.broadcast %cst_7 : f32 to vector<1x128xf32>
    %12 = arith.divf %11, %10 : vector<1x128xf32>
    %c0_8 = arith.constant 0 : index
    %c0_9 = arith.constant 0 : index
    %13 = vector.load %arg4[%c0_8, %c0_9] : memref<1x128xf32, #tpu.memory_space<vmem>>, vector<1x128xf32>
    tpu.vector_store %arg4[%c0_8, %c0_9], %12 {strides = array<i32>} : memref<1x128xf32, #tpu.memory_space<vmem>>, vector<1x128xf32>,
    return
  }
  func.func @transform_0(%arg0: i32) -> (i32, i32) {
    %c0_i32 = arith.constant 0 : i32
    %c0_i32_0 = arith.constant 0 : i32
    %c0_i32_1 = arith.constant 0 : i32
    return %c0_i32, %c0_i32_0 : i32, i32
  }
  func.func @transform_1(%arg0: i32) -> (i32, i32) {
    %c0_i32 = arith.constant 0 : i32
    %c0_i32_0 = arith.constant 0 : i32
    return %c0_i32, %arg0 : i32, i32
  }
  func.func @transform_2(%arg0: i32) -> (i32, i32) {
    %c0_i32 = arith.constant 0 : i32
    %c0_i32_0 = arith.constant 0 : i32
    %c0_i32_1 = arith.constant 0 : i32
    return %c0_i32, %c0_i32_0 : i32, i32
  }
  func.func @transform_3(%arg0: i32) -> (i32, i32) {
    %c0_i32 = arith.constant 0 : i32
    %c0_i32_0 = arith.constant 0 : i32
    return %c0_i32, %arg0 : i32, i32
  }
}

</mosaic_0001>

<bundles_post_ra>
// kernel: condigan_discriminator_forward.17
= control target key start
LH: loop header
LB: loop body
LE: loop exit
PB: predicated region body
PF: predicated region fallthrough
CT: control target
= control target key end

     0   :  { %s474_s12 = smov 0   ;;  %s476_s13 = smov 0   ;;  %s532_s0 = inlined_call_operand.vmem [shape: bf16[8,25], index: 0, kind: input, shape index: {}]   ;;  %s533_s1 = inlined_call_operand.vmem [shape: bf16[25,512], index: 1, kind: input, shape index: {}]   ;;  %s534_s2 = inlined_call_operand.vmem [shape: f32[8,1], index: 2, kind: input, shape index: {}]   ;;  %s535_s3 = inlined_call_operand.vmem [shape: f32[8,512], index: 3, kind: output, shape index: {}]  }
   0x1   :  { %s478_s14 = smov 0  }
   0x2 LB: > { %s376_s15 = sadd.s32 4294967295, %s450_s14   ;;  %s491_s16 = sadd.s32 1, %s450_s14   ;;  %s450_s14 = sphi %s478_s14, %s538_s14   ;;  %s446_s13 = sphi %s476_s13, %s537_s13   ;;  %s442_s12 = sphi %s474_s12, %s536_s12  }
   0x3   : > { %s38_s17 = ssub.s32 %s450_s14, %s491_s16  ;;  %s41_s18 = sadd.s32 1, %s446_s13 }
   0x4   : > { %p39_p0 = scmp.eq.s32.totalorder %s38_s17, 0  ;;  %p48_p1 = scmp.ne.s32.totalorder %s446_s13, %s442_s12 }
   0x5   : > { %p49_p2 = scmp.eq.s32.totalorder %s450_s14, 0  ;;  %p379_p4 = scmp.ge.s32.totalorder %s450_s14, 2 }
   0x6   : > { %s500_s19 = scalar_select %p39_p0, %s446_s13, %s41_s18  }
   0x7   : > { %p50_p3 = por %p49_p2, %p48_p1  ;;  %127 = sbr.rel (%p379_p4) target bundleno = 18 (0x12), region = 24 }
   0xc   : > { %130 = sbr.rel (!%p50_p3) target bundleno = 18 (0x12), region = 28  ;;  %s132_s20 = sand.u32 (%p50_p3), 1, %s446_s13  }
   0xd   : > { %s394_s21 = sshll.u32 (%p50_p3), %s450_s14, 3  ;;  %s380_s22 = sshll.u32 (%p50_p3), %s132_s20, 5 }
   0xe   : > { %s137_s25 = scalar_lea.vmem (%p50_p3), %s533_s1, %s394_s21  ;;  %s134_s26 = scalar_lea.vmem (%p50_p3), [#allocation2], %s380_s22 }
   0xf   : > { %v172_v0 = vld [vmem:[%s137_s25] sm:$0xff] (%p50_p3)  ;;  %v174_v1 = vld [vmem:[%s137_s25 + $0x10] sm:$0xff] (%p50_p3) }
  0x10   : > { %v176_v2 = vld [vmem:[%s137_s25 + $0x20] sm:$0xff] (%p50_p3)  ;;  %173 = vst [vmem:[%s134_s26] sm:$0xff] (%p50_p3), %v172_v0  ;;  %175 = vst [vmem:[%s134_s26 + $0x8] sm:$0xff] (%p50_p3), %v174_v1  ;;  %v178_v3 = vld [vmem:[%s137_s25 + $0x30] sm:$0xff] (%p50_p3) }
  0x11   : > { %177 = vst [vmem:[%s134_s26 + $0x10] sm:$0xff] %v176_v2  ;;  %179 = vst [vmem:[%s134_s26 + $0x18] sm:$0xff] %v178_v3 }
  0x12 PF: > { %p383_p5 = scmp.ge.s32.totalorder %s450_s14, 1  ;;  %p184_p6 = scmp.lt.s32.totalorder %s450_s14, 3 }
  0x14   : > { %p185_p7 = pnand %p383_p5, %p184_p6 }
  0x15   : > { %s191_s27 = sand.u32 (!%p185_p7), 1, %s442_s12   ;;  %s385_s7 = sshll.u32 (!%p185_p7), %s376_s15, 1 }
  0x16   : > { %188 = sbr.rel (%p185_p7) target bundleno = 241 (0xf1), region = 66  ;;  %s384_s30 = sshll.u32 (!%p185_p7), %s191_s27, 5 }
  0x17   : > { %s193_s4 = scalar_lea.vmem (!%p185_p7), [#allocation2], %s384_s30  ;;  %p216_p8 = scmp.lt.s32.totalorder (!%p185_p7), %s385_s7, 3 }
  0x1b   : > { %vm255_vm0 = vcmask 1043456   ;;  %vm256_vm1 = vcmask 1044480   ;;  %v227_v4 = vld [vmem:[%s534_s2] sm:$0xff]  ;;  %v452_v5 = vmov 65535   ;;  %v453_v7 = vmov 0   ;;  %s540_s7 = smov (!%p216_p8, %s385_s7), 3 }
  0x1c   : > { %v257_v6 = vsel %vm255_vm0, 4294967295, %v452_v5  ;;  %297 = vmatprep.mubr.bf16.mxu0 %v453_v7  ;;  %421 = vset.pattern.permute.xlu0 %v453_v7  ;;  %v422_v9 = vld [vmem:[%s193_s4 + $0x14] ss:$8 sps:$4 sm:$0x1f]   ;;  %v425_v12 = vld [vmem:[%s193_s4 + $0x4] ss:$8 sps:$4 sm:$0xff]  }
  0x1d   : > { %v258_v8 = vsel %vm256_vm1, %v257_v6, 0  ;;  %230 = vperm.xlu0 %421, %v227_v4   ;;  %v424_v10 = vld [vmem:[%s193_s4 + $0x10] ss:$8 sps:$4 sm:$0x1f]   ;;  %v427_v14 = vld [vmem:[%s193_s4] ss:$8 sps:$4 sm:$0xff]  }
  0x1e   : > { %v263_v11 = vand.u32 %v422_v9, %v258_v8  ;;  %v260_v13 = vand.u32 %v424_v10, %v258_v8  ;;  %v222_v15 = vld [vmem:[%s532_s0] sm:$0xf]  ;;  %vm251_vm2 = vcmask 203776   ;;  %s386_s8 = sshll.u32 %s540_s7, 3 }
  0x1f   : > { %s219_s11 = scalar_lea.vmem %s535_s3, %s386_s8 }
  0x20   : > { %277 = vmatprep.subr.bf16.mxu0 %v263_v11 }
  0x21   : > { %278 = vmatpush1.bf16.msra.mxu0 %v260_v13 }
  0x22   : > { %279 = vmatprep.subr.bf16.mxu0 %v425_v12 }
  0x25   : > { %280 = vmatpush1.bf16.msra.mxu0 %v427_v14 }
  0x28   : > { %391 = vmatmul.mubr.msk.bf16.vlgmr.msra.gmra.mxu0 %vm251_vm2, %v222_v15 }
  0x98   : > { %v231_v16 = vpop.permute.xlu0 %230 }
  0xe8   : > { %v299_v17 = vpop.f32.mrf.mxu0 }
  0xe9   : > { %v300_v18 = vadd.f32 %v299_v17, %v231_v16 }
  0xea   : > { %v301_v19 = vpop.f32.mrf.mxu0 }
  0xeb   : > { %vm306_vm3 = vcmp.ge.f32.partialorder %v300_v18, 0.0  ;;  %v308_v20 = vmul.f32 0.2, %v300_v18  ;;  %v302_v21 = vadd.f32 %v301_v19, %v231_v16 }
  0xec   : > { %v303_v22 = vpop.f32.mrf.mxu0 }
  0xed   : > { %v310_v23 = vsel %vm306_vm3, %v300_v18, %v308_v20  ;;  %vm307_vm4 = vcmp.ge.f32.partialorder %v302_v21, 0.0  ;;  %v309_v24 = vmul.f32 0.2, %v302_v21 }
  0xee   : > { %312 = vst [vmem:[%s219_s11] sm:$0xff] %v310_v23  ;;  %v304_v25 = vpop.f32.mrf.mxu0 }
  0xef   : > { %v311_v26 = vsel %vm307_vm4, %v302_v21, %v309_v24 }
  0xf0   : > { %313 = vst [vmem:[%s219_s11 + $0x8] sm:$0xff] %v311_v26 }
  0xf1 PF: > { %p10_p9 = scmp.ge.s32.totalorder %s491_s16, 4   ;;  %s536_s12 = smov %s446_s13 }
  0xf2   : > { %s537_s13 = smov %s500_s19  ;;  %s538_s14 = smov %s491_s16 }
  0xf3   :  { %12 = sbr.rel (!%p10_p9) target bundleno = 2 (0x2), region = 105 }

// kernel: condigan_discriminator_forward.19
= control target key start
LH: loop header
LB: loop body
LE: loop exit
PB: predicated region body
PF: predicated region fallthrough
CT: control target
= control target key end

     0   :  { %v59_v0 = vmov 0   ;;  %s104_s2 = inlined_call_operand.vmem [shape: f32[16,1], index: 2, kind: input, shape index: {}]   ;;  %s105_s1 = inlined_call_operand.vmem [shape: f32[16,1], index: 1, kind: input, shape index: {}]   ;;  %s106_s0 = inlined_call_operand.vmem [shape: f32[16,128], index: 0, kind: input, shape index: {}]   ;;  %s107_s3 = inlined_call_operand.vmem [shape: f32[16,128], index: 3, kind: output, shape index: {}]  }
   0x1   :  { %58 = vset.pattern.permute.xlu1 %v59_v0  ;;  %57 = vset.pattern.permute.xlu0 %v59_v0  ;;  %v30_v1 = vld [vmem:[%s104_s2] sm:$0xff]  ;;  %v31_v3 = vld [vmem:[%s104_s2 + $0x8] sm:$0xff] }
   0x2   :  { %v16_v2 = vld [vmem:[%s105_s1] sm:$0xff]  ;;  %34 = vperm.xlu1 %58, %v30_v1   ;;  %v17_v4 = vld [vmem:[%s105_s1 + $0x8] sm:$0xff] }
   0x3   :  { %20 = vperm.xlu0 %57, %v16_v2   ;;  %v14_v5 = vld [vmem:[%s106_s0] sm:$0xff]  ;;  %v15_v9 = vld [vmem:[%s106_s0 + $0x8] sm:$0xff] }
   0x6   :  { %39 = vperm.xlu1 %58, %v31_v3  }
   0x7   :  { %25 = vperm.xlu0 %57, %v17_v4  }
  0x7d   :  { %v35_v6 = vpop.permute.xlu1 %34 }
  0x7e   :  { %v21_v7 = vpop.permute.xlu0 %20 }
  0x7f   :  { %v28_v8 = vmul.f32 %v21_v7, %v14_v5 }
  0x81   :  { %v42_v10 = vadd.f32 %v35_v6, %v28_v8  ;;  %v40_v14 = vpop.permute.xlu1 %39 }
  0x82   :  { %v26_v11 = vpop.permute.xlu0 %25 }
  0x83   :  { %vm44_vm0 = vcmp.ge.f32.partialorder %v42_v10, 0.0  ;;  %v46_v12 = vmul.f32 0.2, %v42_v10  ;;  %v29_v13 = vmul.f32 %v26_v11, %v15_v9 }
  0x85   :  { %v48_v15 = vsel %vm44_vm0, %v42_v10, %v46_v12  ;;  %v43_v16 = vadd.f32 %v40_v14, %v29_v13 }
  0x86   :  { %50 = vst [vmem:[%s107_s3] sm:$0xff] %v48_v15 }
  0x87   :  { %vm45_vm1 = vcmp.ge.f32.partialorder %v43_v16, 0.0  ;;  %v47_v17 = vmul.f32 0.2, %v43_v16 }
  0x89   :  { %v49_v18 = vsel %vm45_vm1, %v43_v16, %v47_v17 }
  0x8a   :  { %51 = vst [vmem:[%s107_s3 + $0x8] sm:$0xff] %v49_v18 }

// kernel: condigan_discriminator_forward.18
= control target key start
LH: loop header
LB: loop body
LE: loop exit
PB: predicated region body
PF: predicated region fallthrough
CT: control target
= control target key end

     0   :  { %v255_v0 = vmov 0   ;;  %vm135_vm0 = vcmask 588800   ;;  %vm139_vm1 = vcmask 1043456   ;;  %vm19_vm2 = vcmask 7168   ;;  %s377_s1 = inlined_call_operand.vmem [shape: bf16[200,128], index: 1, kind: input, shape index: {}]   ;;  %s378_s0 = inlined_call_operand.vmem [shape: bf16[16,200], index: 0, kind: input, shape index: {}]   ;;  %s379_s3 = inlined_call_operand.vmem [shape: f32[16,1], index: 3, kind: output, shape index: {1}]   ;;  %s380_s2 = inlined_call_operand.vmem [shape: f32[16,128], index: 2, kind: output, shape index: {0}]   ;;  %s381_s4 = inlined_call_operand.vmem [shape: f32[16,1], index: 4, kind: output, shape index: {2}]  }
   0x1   :  { %143 = vmatprep.subr.bf16.mxu0 %v255_v0  ;;  %v239_v1 = vld [vmem:[%s377_s1 + $0x38] sm:$0xff]   ;;  %v240_v2 = vld [vmem:[%s377_s1 + $0x30] sm:$0xff]   ;;  %v241_v3 = vld [vmem:[%s377_s1 + $0x28] sm:$0xff]   ;;  %v256_v17 = vmov 0.0  }
   0x2   :  { %144 = vmatpush1.bf16.msra.mxu0 %v239_v1  ;;  %v242_v4 = vld [vmem:[%s377_s1 + $0x20] sm:$0xff]   ;;  %v243_v6 = vld [vmem:[%s377_s1 + $0x18] sm:$0xff]   ;;  %v244_v7 = vld [vmem:[%s377_s1 + $0x10] sm:$0xff]   ;;  %20 = vst.msk [vmem:[%s379_s3] sm:$0xff] %vm19_vm2, %v256_v17 }
   0x3   :  { %145 = vmatprep.subr.bf16.mxu0 %v255_v0  ;;  %v254_v5 = vld [vmem:[%s378_s0 + $0x4] ss:$8 sps:$4 sm:$0xff]   ;;  %v247_v10 = vld [vmem:[%s377_s1 + $0x60] ss:$0 sps:$4 sm:$0xff]   ;;  %v248_v12 = vld [vmem:[%s377_s1 + $0x58] sm:$0xff]   ;;  %21 = vst.msk [vmem:[%s379_s3 + $0x8] sm:$0xff] %vm19_vm2, %v256_v17 }
   0x4   :  { %236 = vmatprep.mubr.msk.bf16.mxu0 %vm135_vm0, %v254_v5  ;;  %v245_v8 = vld [vmem:[%s377_s1 + $0x8] sm:$0xff]   ;;  %v246_v9 = vld [vmem:[%s377_s1] sm:$0xff]   ;;  %v141_v11 = vsel %vm139_vm1, %v247_v10, 0  ;;  %v249_v13 = vld [vmem:[%s377_s1 + $0x50] sm:$0xff]   ;;  %22 = vst.msk [vmem:[%s381_s4] sm:$0xff] %vm19_vm2, %v256_v17 }
   0x5   :  { %v250_v14 = vld [vmem:[%s377_s1 + $0x48] sm:$0xff]   ;;  %v251_v15 = vld [vmem:[%s377_s1 + $0x40] sm:$0xff]   ;;  %23 = vst.msk [vmem:[%s381_s4 + $0x8] sm:$0xff] %vm19_vm2, %v256_v17 }
   0x6   :  { %146 = vmatpush1.bf16.msra.mxu0 %v240_v2  ;;  %v252_v16 = vld [vmem:[%s378_s0] ss:$8 sps:$4 sm:$0xff]  }
   0x7   :  { %147 = vmatprep.subr.bf16.mxu0 %v255_v0 }
   0x9   :  { %v186_v24 = vld [vmem:[%s379_s3] sm:$0xff] }
   0xa   :  { %148 = vmatpush1.bf16.msra.mxu0 %v241_v3  ;;  %v187_v29 = vld [vmem:[%s379_s3 + $0x8] sm:$0xff] }
   0xb   :  { %149 = vmatprep.subr.bf16.mxu0 %v255_v0  ;;  %v197_v26 = vld [vmem:[%s381_s4] sm:$0xff] }
   0xc   :  { %v198_v32 = vld [vmem:[%s381_s4 + $0x8] sm:$0xff] }
   0xe   :  { %150 = vmatpush1.bf16.msra.mxu0 %v242_v4 }
   0xf   :  { %151 = vmatprep.subr.bf16.mxu0 %v255_v0 }
  0x12   :  { %152 = vmatpush1.bf16.msra.mxu0 %v243_v6 }
  0x13   :  { %153 = vmatprep.subr.bf16.mxu0 %v255_v0 }
  0x16   :  { %154 = vmatpush1.bf16.msra.mxu0 %v244_v7 }
  0x17   :  { %155 = vmatprep.subr.bf16.mxu0 %v255_v0 }
  0x1a   :  { %156 = vmatpush1.bf16.msra.mxu0 %v245_v8 }
  0x1b   :  { %157 = vmatprep.subr.bf16.mxu0 %v255_v0 }
  0x1e   :  { %158 = vmatpush1.bf16.msra.mxu0 %v246_v9 }
  0x1f   :  { %165 = vmatprep.subr.bf16.mxu0 %v255_v0 }
  0x22   :  { %166 = vmatpush2.bf16.msra.mxu0 %v141_v11 }
  0x23   :  { %167 = vmatprep.subr.bf16.mxu0 %v255_v0 }
  0x26   :  { %168 = vmatpush2.bf16.msra.mxu0 %v248_v12 }
  0x27   :  { %169 = vmatprep.subr.bf16.mxu0 %v255_v0 }
  0x2a   :  { %170 = vmatpush2.bf16.msra.mxu0 %v249_v13 }
  0x2b   :  { %171 = vmatprep.subr.bf16.mxu0 %v255_v0 }
  0x2e   :  { %172 = vmatpush2.bf16.msra.mxu0 %v250_v14 }
  0x2f   :  { %173 = vmatprep.subr.bf16.mxu0 %v255_v0 }
  0x32   :  { %174 = vmatpush2.bf16.msra.mxu0 %v251_v15 }
  0x35   :  { %176 = vmatmul.mubr.bf16.vlgmr.msra.gmra.mxu0 %v252_v16 }
  0xf5   :  { %v177_v18 = vpop.f32.mrf.mxu0 }
  0xf6   :  { %184 = vst [vmem:[%s380_s2] sm:$0xff] %v177_v18  ;;  %188 = vadd.xlane.f32.xlu0 %v177_v18  ;;  %v199_v19 = vmul.f32 %v177_v18, %v177_v18 }
  0xf7   :  { %v179_v20 = vpop.f32.mrf.mxu0 }
  0xf8   :  { %201 = vadd.xlane.f32.xlu1 %v199_v19 }
  0xf9   :  { %v180_v21 = vpop.f32.mrf.mxu0 }
  0xfa   :  { %185 = vst [vmem:[%s380_s2 + $0x8] sm:$0xff] %v180_v21  ;;  %190 = vadd.xlane.f32.xlu0 %v180_v21  ;;  %v200_v22 = vmul.f32 %v180_v21, %v180_v21 }
  0xfb   :  { %v182_v23 = vpop.f32.mrf.mxu0 }
  0xfc   :  { %203 = vadd.xlane.f32.xlu1 %v200_v22 }
 0x17f   :  { %v189_v25 = vpop.xlane.xlu0 %188 }
 0x180   :  { %v192_v27 = vadd.f32 %v189_v25, %v186_v24 }
 0x181   :  { %v202_v28 = vpop.xlane.xlu1 %201 }
 0x182   :  { %195 = vst.msk [vmem:[%s379_s3] sm:$0xff] %vm19_vm2, %v192_v27  ;;  %v205_v30 = vadd.f32 %v202_v28, %v197_v26 }
 0x183   :  { %v191_v31 = vpop.xlane.xlu0 %190 }
 0x184   :  { %207 = vst.msk [vmem:[%s381_s4] sm:$0xff] %vm19_vm2, %v205_v30  ;;  %v193_v33 = vadd.f32 %v191_v31, %v187_v29 }
 0x185   :  { %v204_v34 = vpop.xlane.xlu1 %203 }
 0x186   :  { %196 = vst.msk [vmem:[%s379_s3 + $0x8] sm:$0xff] %vm19_vm2, %v193_v33  ;;  %v206_v35 = vadd.f32 %v204_v34, %v198_v32 }
 0x188   :  { %208 = vst.msk [vmem:[%s381_s4 + $0x8] sm:$0xff] %vm19_vm2, %v206_v35 }

// kernel: condigan_discriminator_forward.20
= control target key start
LH: loop header
LB: loop body
LE: loop exit
PB: predicated region body
PF: predicated region fallthrough
CT: control target
= control target key end

     0   :  { %v542_v0 = vmov 0   ;;  %vm274_vm0 = vcmask 130048   ;;  %vm19_vm1 = vcmask 7168   ;;  %v543_v34 = vmov 0.0   ;;  %s779_s1 = inlined_call_operand.vmem [shape: bf16[400,128], index: 1, kind: input, shape index: {}]   ;;  %s780_s0 = inlined_call_operand.vmem [shape: bf16[32,400], index: 0, kind: input, shape index: {}]   ;;  %s781_s3 = inlined_call_operand.vmem [shape: f32[32,1], index: 3, kind: output, shape index: {1}]   ;;  %s782_s2 = inlined_call_operand.vmem [shape: f32[32,128], index: 2, kind: output, shape index: {0}]   ;;  %s783_s4 = inlined_call_operand.vmem [shape: f32[32,1], index: 4, kind: output, shape index: {2}]  }
   0x1   :  { %330 = vmatprep.subr.bf16.mxu1 %v542_v0  ;;  %v505_v1 = vld [vmem:[%s779_s1 + $0x78] sm:$0xff]   ;;  %v508_v4 = vld [vmem:[%s779_s1 + $0x70] sm:$0xff]   ;;  %v511_v7 = vld [vmem:[%s779_s1 + $0x68] sm:$0xff]   ;;  %20 = vst.msk [vmem:[%s781_s3] sm:$0xff] %vm19_vm1, %v543_v34 }
   0x2   :  { %v506_v2 = vld [vmem:[%s779_s1 + $0xb8] sm:$0xff]   ;;  %475 = vmatprep.subr.bf16.mxu0 %v505_v1  ;;  %v509_v5 = vld [vmem:[%s779_s1 + $0xb0] sm:$0xff]   ;;  %v512_v8 = vld [vmem:[%s779_s1 + $0xa8] sm:$0xff]   ;;  %21 = vst.msk [vmem:[%s781_s3 + $0x8] sm:$0xff] %vm19_vm1, %v543_v34 }
   0x3   :  { %v507_v3 = vld [vmem:[%s779_s1 + $0x38] sm:$0xff]   ;;  %331 = vmatpush1.bf16.msra.mxu1 %v506_v2  ;;  %v510_v6 = vld [vmem:[%s779_s1 + $0x30] sm:$0xff]   ;;  %v513_v9 = vld [vmem:[%s779_s1 + $0x28] sm:$0xff]   ;;  %22 = vst.msk [vmem:[%s781_s3 + $0x10] sm:$0xff] %vm19_vm1, %v543_v34 }
   0x4   :  { %476 = vmatpush3.bf16.msra.mxu0 %v507_v3  ;;  %332 = vmatprep.subr.bf16.mxu1 %v542_v0  ;;  %v514_v10 = vld [vmem:[%s779_s1 + $0x60] sm:$0xff]   ;;  %v517_v13 = vld [vmem:[%s779_s1 + $0x58] sm:$0xff]   ;;  %v520_v16 = vld [vmem:[%s779_s1 + $0x50] sm:$0xff]   ;;  %23 = vst.msk [vmem:[%s781_s3 + $0x18] sm:$0xff] %vm19_vm1, %v543_v34 }
   0x5   :  { %477 = vmatprep.subr.bf16.mxu0 %v508_v4  ;;  %v515_v11 = vld [vmem:[%s779_s1 + $0xa0] sm:$0xff]   ;;  %v518_v14 = vld [vmem:[%s779_s1 + $0x98] sm:$0xff]   ;;  %v521_v17 = vld [vmem:[%s779_s1 + $0x90] sm:$0xff]   ;;  %24 = vst.msk [vmem:[%s783_s4] sm:$0xff] %vm19_vm1, %v543_v34 }
   0x6   :  { %v516_v12 = vld [vmem:[%s779_s1 + $0x20] sm:$0xff]   ;;  %v519_v15 = vld [vmem:[%s779_s1 + $0x18] sm:$0xff]   ;;  %v522_v18 = vld [vmem:[%s779_s1 + $0x10] sm:$0xff]   ;;  %25 = vst.msk [vmem:[%s783_s4 + $0x8] sm:$0xff] %vm19_vm1, %v543_v34 }
   0x7   :  { %333 = vmatpush1.bf16.msra.mxu1 %v509_v5  ;;  %v523_v19 = vld [vmem:[%s779_s1 + $0x48] sm:$0xff]   ;;  %v526_v22 = vld [vmem:[%s779_s1 + $0x40] sm:$0xff]   ;;  %26 = vst.msk [vmem:[%s783_s4 + $0x10] sm:$0xff] %vm19_vm1, %v543_v34  ;;  %27 = vst.msk [vmem:[%s783_s4 + $0x18] sm:$0xff] %vm19_vm1, %v543_v34 }
   0x8   :  { %478 = vmatpush3.bf16.msra.mxu0 %v510_v6  ;;  %334 = vmatprep.subr.bf16.mxu1 %v542_v0  ;;  %v524_v20 = vld [vmem:[%s779_s1 + $0x88] sm:$0xff]   ;;  %v531_v23 = vld [vmem:[%s780_s0 + $0x4] ss:$16 sps:$4 sm:$0xff]   ;;  %v529_v27 = vld [vmem:[%s780_s0] ss:$16 sps:$4 sm:$0xff]  }
   0x9   :  { %479 = vmatprep.subr.bf16.mxu0 %v511_v7  ;;  %v525_v21 = vld [vmem:[%s779_s1 + $0x8] sm:$0xff]   ;;  %v527_v24 = vld [vmem:[%s779_s1 + $0x80] sm:$0xff]   ;;  %313 = vmatprep.mubr.bf16.mxu0 %v531_v23 }
   0xa   :  { %v535_v25 = vld [vmem:[%s780_s0 + $0xc] ss:$16 sps:$4 sm:$0xff]   ;;  %v528_v26 = vld [vmem:[%s779_s1] sm:$0xff]   ;;  %v533_v30 = vld [vmem:[%s780_s0 + $0x8] ss:$16 sps:$4 sm:$0xff]  }
   0xb   :  { %335 = vmatpush1.bf16.msra.mxu1 %v512_v8  ;;  %473 = vmatprep.mubr.msk.bf16.mxu1 %vm274_vm0, %v535_v25  ;;  %v532_v28 = vld [vmem:[%s779_s1 + $0xc0] sm:$0xff]   ;;  %v539_v31 = vld [vmem:[%s780_s0 + $0x2c] ss:$16 sps:$4 sm:$0xff]   ;;  %v541_v33 = vld [vmem:[%s780_s0 + $0x28] ss:$16 sps:$4 sm:$0xff]  }
   0xc   :  { %480 = vmatpush3.bf16.msra.mxu0 %v513_v9  ;;  %336 = vmatprep.subr.bf16.mxu1 %v542_v0  ;;  %v536_v29 = vld [vmem:[%s780_s0 + $0x24] ss:$16 sps:$4 sm:$0xff]   ;;  %v538_v32 = vld [vmem:[%s780_s0 + $0x20] ss:$16 sps:$4 sm:$0xff]   ;;  %v384_v7 = vld [vmem:[%s781_s3 + $0x8] sm:$0xff] }
   0xd   :  { %481 = vmatprep.subr.bf16.mxu0 %v514_v10  ;;  %v383_v63 = vld [vmem:[%s781_s3] sm:$0xff]  ;;  %v405_v4 = vld [vmem:[%s783_s4 + $0x8] sm:$0xff]  ;;  %v385_v10 = vld [vmem:[%s781_s3 + $0x10] sm:$0xff] }
   0xe   :  { %v404_v2 = vld [vmem:[%s783_s4] sm:$0xff] }
   0xf   :  { %337 = vmatpush1.bf16.msra.mxu1 %v515_v11 }
  0x10   :  { %482 = vmatpush3.bf16.msra.mxu0 %v516_v12  ;;  %338 = vmatprep.subr.bf16.mxu1 %v542_v0 }
  0x11   :  { %483 = vmatprep.subr.bf16.mxu0 %v517_v13  ;;  %v406_v13 = vld [vmem:[%s783_s4 + $0x10] sm:$0xff] }
  0x13   :  { %339 = vmatpush1.bf16.msra.mxu1 %v518_v14 }
  0x14   :  { %484 = vmatpush3.bf16.msra.mxu0 %v519_v15  ;;  %340 = vmatprep.subr.bf16.mxu1 %v542_v0 }
  0x15   :  { %485 = vmatprep.subr.bf16.mxu0 %v520_v16  ;;  %v386_v16 = vld [vmem:[%s781_s3 + $0x18] sm:$0xff] }
  0x17   :  { %341 = vmatpush1.bf16.msra.mxu1 %v521_v17 }
  0x18   :  { %486 = vmatpush3.bf16.msra.mxu0 %v522_v18  ;;  %342 = vmatprep.subr.bf16.mxu1 %v542_v0 }
  0x19   :  { %487 = vmatprep.subr.bf16.mxu0 %v523_v19 }
  0x1b   :  { %343 = vmatpush1.bf16.msra.mxu1 %v524_v20  ;;  %v407_v20 = vld [vmem:[%s783_s4 + $0x18] sm:$0xff] }
  0x1c   :  { %488 = vmatpush3.bf16.msra.mxu0 %v525_v21  ;;  %344 = vmatprep.subr.bf16.mxu1 %v542_v0 }
  0x1d   :  { %489 = vmatprep.subr.bf16.mxu0 %v526_v22 }
  0x1f   :  { %345 = vmatpush1.bf16.msra.mxu1 %v527_v24 }
  0x20   :  { %490 = vmatpush3.bf16.msra.mxu0 %v528_v26  ;;  %360 = vmatprep.subr.bf16.mxu1 %v542_v0 }
  0x23   :  { %314 = vmatmul.mubr.bf16.vlgmr.msra.gmra.mxu0 %v529_v27  ;;  %361 = vmatpush2.bf16.msra.mxu1 %v532_v28 }
  0x24   :  { %321 = vmatprep.mubr.bf16.mxu0 %v536_v29 }
  0x26   :  { %363 = vmatmul.mubr.bf16.vlgmr.msra.gmra.mxu1 %v533_v30 }
  0x27   :  { %474 = vmatprep.mubr.msk.bf16.mxu1 %vm274_vm0, %v539_v31 }
  0x2b   :  { %322 = vmatmul.mubr.bf16.gmra.mxu0 %v538_v32 }
  0x2e   :  { %371 = vmatmul.mubr.bf16.gmra.mxu1 %v541_v33 }
  0xe3   :  { %v491_v35 = vpop.f32.mrf.mxu0 }
  0xe5   :  { %v492_v36 = vpop.f32.mrf.mxu0 }
  0xe6   :  { %v493_v37 = vadd.f32 %v492_v36, %v491_v35  ;;  %v364_v38 = vpop.f32.mrf.mxu1 }
  0xe7   :  { %v494_v39 = vpop.f32.mrf.mxu0 }
  0xe8   :  { %v365_v40 = vadd.f32 %v493_v37, %v364_v38  ;;  %v366_v41 = vpop.f32.mrf.mxu1 }
  0xe9   :  { %v495_v42 = vpop.f32.mrf.mxu0 }
  0xea   :  { %379 = vst [vmem:[%s782_s2] sm:$0xff] %v365_v40  ;;  %v496_v43 = vadd.f32 %v495_v42, %v494_v39  ;;  %v367_v44 = vpop.f32.mrf.mxu1  ;;  %387 = vadd.xlane.f32.xlu0 %v365_v40  ;;  %v408_v48 = vmul.f32 %v365_v40, %v365_v40 }
  0xeb   :  { %v497_v45 = vpop.f32.mrf.mxu0 }
  0xec   :  { %v368_v46 = vadd.f32 %v496_v43, %v367_v44  ;;  %v369_v47 = vpop.f32.mrf.mxu1 }
  0xed   :  { %v498_v49 = vpop.f32.mrf.mxu0 }
  0xee   :  { %380 = vst [vmem:[%s782_s2 + $0x8] sm:$0xff] %v368_v46  ;;  %v499_v50 = vadd.f32 %v498_v49, %v497_v45  ;;  %v372_v51 = vpop.f32.mrf.mxu1  ;;  %412 = vadd.xlane.f32.xlu0 %v408_v48  ;;  %v409_v52 = vmul.f32 %v368_v46, %v368_v46 }
  0xef   :  { %v500_v53 = vpop.f32.mrf.mxu0 }
  0xf0   :  { %v373_v54 = vadd.f32 %v499_v50, %v372_v51  ;;  %v374_v55 = vpop.f32.mrf.mxu1  ;;  %414 = vadd.xlane.f32.xlu1 %v409_v52 }
  0xf1   :  { %v501_v56 = vpop.f32.mrf.mxu0 }
  0xf2   :  { %381 = vst [vmem:[%s782_s2 + $0x10] sm:$0xff] %v373_v54  ;;  %v502_v57 = vadd.f32 %v501_v56, %v500_v53  ;;  %v375_v58 = vpop.f32.mrf.mxu1  ;;  %389 = vadd.xlane.f32.xlu0 %v368_v46  ;;  %v410_v61 = vmul.f32 %v373_v54, %v373_v54 }
  0xf4   :  { %v376_v59 = vadd.f32 %v502_v57, %v375_v58  ;;  %v377_v60 = vpop.f32.mrf.mxu1  ;;  %391 = vadd.xlane.f32.xlu1 %v373_v54 }
  0xf6   :  { %382 = vst [vmem:[%s782_s2 + $0x18] sm:$0xff] %v376_v59  ;;  %416 = vadd.xlane.f32.xlu0 %v410_v61  ;;  %v411_v62 = vmul.f32 %v376_v59, %v376_v59 }
  0xf8   :  { %393 = vadd.xlane.f32.xlu1 %v376_v59 }
  0xfc   :  { %418 = vadd.xlane.f32.xlu1 %v411_v62 }
 0x173   :  { %v388_v0 = vpop.xlane.xlu0 %387 }
 0x174   :  { %v395_v1 = vadd.f32 %v388_v0, %v383_v63 }
 0x176   :  { %400 = vst.msk [vmem:[%s781_s3] sm:$0xff] %vm19_vm1, %v395_v1 }
 0x177   :  { %v413_v3 = vpop.xlane.xlu0 %412 }
 0x178   :  { %v420_v5 = vadd.f32 %v413_v3, %v404_v2 }
 0x179   :  { %v415_v6 = vpop.xlane.xlu1 %414 }
 0x17a   :  { %424 = vst.msk [vmem:[%s783_s4] sm:$0xff] %vm19_vm1, %v420_v5  ;;  %v421_v8 = vadd.f32 %v415_v6, %v405_v4 }
 0x17b   :  { %v390_v9 = vpop.xlane.xlu0 %389 }
 0x17c   :  { %425 = vst.msk [vmem:[%s783_s4 + $0x8] sm:$0xff] %vm19_vm1, %v421_v8  ;;  %v396_v11 = vadd.f32 %v390_v9, %v384_v7 }
 0x17d   :  { %v392_v12 = vpop.xlane.xlu1 %391 }
 0x17e   :  { %401 = vst.msk [vmem:[%s781_s3 + $0x8] sm:$0xff] %vm19_vm1, %v396_v11  ;;  %v397_v14 = vadd.f32 %v392_v12, %v385_v10 }
 0x17f   :  { %v417_v15 = vpop.xlane.xlu0 %416 }
 0x180   :  { %402 = vst.msk [vmem:[%s781_s3 + $0x10] sm:$0xff] %vm19_vm1, %v397_v14  ;;  %v422_v17 = vadd.f32 %v417_v15, %v406_v13 }
 0x181   :  { %v394_v18 = vpop.xlane.xlu1 %393 }
 0x182   :  { %426 = vst.msk [vmem:[%s783_s4 + $0x10] sm:$0xff] %vm19_vm1, %v422_v17  ;;  %v398_v19 = vadd.f32 %v394_v18, %v386_v16 }
 0x184   :  { %403 = vst.msk [vmem:[%s781_s3 + $0x18] sm:$0xff] %vm19_vm1, %v398_v19 }
 0x185   :  { %v419_v21 = vpop.xlane.xlu1 %418 }
 0x186   :  { %v423_v22 = vadd.f32 %v419_v21, %v407_v20 }
 0x188   :  { %427 = vst.msk [vmem:[%s783_s4 + $0x18] sm:$0xff] %vm19_vm1, %v423_v22 }

// kernel: condigan_discriminator_forward.21
= control target key start
LH: loop header
LB: loop body
LE: loop exit
PB: predicated region body
PF: predicated region fallthrough
CT: control target
= control target key end

     0   :  { %v97_v0 = vmov 0   ;;  %s166_s1 = inlined_call_operand.vmem [shape: f32[32,1], index: 1, kind: input, shape index: {}]   ;;  %s167_s2 = inlined_call_operand.vmem [shape: f32[32,1], index: 2, kind: input, shape index: {}]   ;;  %s168_s0 = inlined_call_operand.vmem [shape: f32[32,128], index: 0, kind: input, shape index: {}]   ;;  %s169_s3 = inlined_call_operand.vmem [shape: f32[32,128], index: 3, kind: output, shape index: {}]  }
   0x1   :  { %96 = vset.pattern.permute.xlu1 %v97_v0  ;;  %95 = vset.pattern.permute.xlu0 %v97_v0  ;;  %v20_v1 = vld [vmem:[%s166_s1 + $0x10] sm:$0xff]  ;;  %v18_v2 = vld [vmem:[%s166_s1] sm:$0xff]  ;;  %v21_v3 = vld [vmem:[%s166_s1 + $0x18] sm:$0xff] }
   0x2   :  { %34 = vperm.xlu1 %96, %v20_v1   ;;  %24 = vperm.xlu0 %95, %v18_v2   ;;  %v19_v4 = vld [vmem:[%s166_s1 + $0x8] sm:$0xff]  ;;  %v46_v6 = vld [vmem:[%s167_s2] sm:$0xff]  ;;  %v49_v7 = vld [vmem:[%s167_s2 + $0x18] sm:$0xff] }
   0x3   :  { %v47_v5 = vld [vmem:[%s167_s2 + $0x8] sm:$0xff]  ;;  %v48_v8 = vld [vmem:[%s167_s2 + $0x10] sm:$0xff]  ;;  %v14_v11 = vld [vmem:[%s168_s0] sm:$0xff] }
   0x4   :  { %v15_v14 = vld [vmem:[%s168_s0 + $0x8] sm:$0xff]  ;;  %v16_v15 = vld [vmem:[%s168_s0 + $0x10] sm:$0xff]  ;;  %v17_v17 = vld [vmem:[%s168_s0 + $0x18] sm:$0xff] }
   0x6   :  { %39 = vperm.xlu1 %96, %v21_v3   ;;  %29 = vperm.xlu0 %95, %v19_v4  }
   0xa   :  { %57 = vperm.xlu1 %96, %v47_v5   ;;  %52 = vperm.xlu0 %95, %v46_v6  }
   0xe   :  { %67 = vperm.xlu1 %96, %v49_v7   ;;  %62 = vperm.xlu0 %95, %v48_v8  }
  0x7d   :  { %v35_v9 = vpop.permute.xlu1 %34  ;;  %v25_v10 = vpop.permute.xlu0 %24 }
  0x7e   :  { %v42_v16 = vmul.f32 %v25_v10, %v14_v11  ;;  %v44_v23 = vmul.f32 %v35_v9, %v16_v15 }
  0x81   :  { %v40_v12 = vpop.permute.xlu1 %39  ;;  %v30_v13 = vpop.permute.xlu0 %29 }
  0x82   :  { %v43_v18 = vmul.f32 %v30_v13, %v15_v14  ;;  %v45_v24 = vmul.f32 %v40_v12, %v17_v17 }
  0x85   :  { %v58_v19 = vpop.permute.xlu1 %57  ;;  %v53_v20 = vpop.permute.xlu0 %52 }
  0x86   :  { %v71_v21 = vadd.f32 %v58_v19, %v43_v18  ;;  %v70_v22 = vadd.f32 %v53_v20, %v42_v16 }
  0x88   :  { %vm75_vm0 = vcmp.ge.f32.partialorder %v71_v21, 0.0  ;;  %v79_v25 = vmul.f32 0.2, %v71_v21  ;;  %vm74_vm1 = vcmp.ge.f32.partialorder %v70_v22, 0.0  ;;  %v78_v26 = vmul.f32 0.2, %v70_v22 }
  0x89   :  { %v68_v27 = vpop.permute.xlu1 %67  ;;  %v63_v28 = vpop.permute.xlu0 %62 }
  0x8a   :  { %v83_v29 = vsel %vm75_vm0, %v71_v21, %v79_v25  ;;  %v82_v30 = vsel %vm74_vm1, %v70_v22, %v78_v26  ;;  %v73_v31 = vadd.f32 %v68_v27, %v45_v24  ;;  %v72_v32 = vadd.f32 %v63_v28, %v44_v23 }
  0x8b   :  { %87 = vst [vmem:[%s169_s3 + $0x8] sm:$0xff] %v83_v29  ;;  %86 = vst [vmem:[%s169_s3] sm:$0xff] %v82_v30 }
  0x8c   :  { %vm77_vm2 = vcmp.ge.f32.partialorder %v73_v31, 0.0  ;;  %v81_v33 = vmul.f32 0.2, %v73_v31  ;;  %vm76_vm3 = vcmp.ge.f32.partialorder %v72_v32, 0.0  ;;  %v80_v34 = vmul.f32 0.2, %v72_v32 }
  0x8e   :  { %v85_v35 = vsel %vm77_vm2, %v73_v31, %v81_v33  ;;  %v84_v36 = vsel %vm76_vm3, %v72_v32, %v80_v34 }
  0x8f   :  { %89 = vst [vmem:[%s169_s3 + $0x18] sm:$0xff] %v85_v35  ;;  %88 = vst [vmem:[%s169_s3 + $0x10] sm:$0xff] %v84_v36 }

// kernel: condigan_discriminator_forward.22
= control target key start
LH: loop header
LB: loop body
LE: loop exit
PB: predicated region body
PF: predicated region fallthrough
CT: control target
= control target key end

     0   :  { %v515_v1 = vmov 0   ;;  %s656_s1 = inlined_call_operand.vmem [shape: bf16[512,128], index: 1, kind: input, shape index: {}]   ;;  %s657_s0 = inlined_call_operand.vmem [shape: bf16[16,512], index: 0, kind: input, shape index: {}]   ;;  %s658_s2 = inlined_call_operand.vmem [shape: f32[16,1], index: 2, kind: input, shape index: {}]   ;;  %s659_s3 = inlined_call_operand.vmem [shape: f32[16,128], index: 3, kind: output, shape index: {}]  }
   0x1   :  { %v477_v0 = vld [vmem:[%s656_s1 + $0x78] sm:$0xff]   ;;  %476 = vset.pattern.permute.xlu0 %v515_v1  ;;  %v481_v5 = vld [vmem:[%s656_s1 + $0x70] sm:$0xff]   ;;  %v485_v9 = vld [vmem:[%s656_s1 + $0x68] sm:$0xff]  }
   0x2   :  { %v478_v2 = vld [vmem:[%s656_s1 + $0xf8] sm:$0xff]   ;;  %431 = vmatprep.subr.bf16.mxu0 %v477_v0  ;;  %v482_v6 = vld [vmem:[%s656_s1 + $0xf0] sm:$0xff]   ;;  %v486_v10 = vld [vmem:[%s656_s1 + $0xe8] sm:$0xff]  }
   0x3   :  { %v479_v3 = vld [vmem:[%s656_s1 + $0x38] sm:$0xff]   ;;  %453 = vmatprep.subr.bf16.mxu1 %v478_v2  ;;  %v483_v7 = vld [vmem:[%s656_s1 + $0x30] sm:$0xff]   ;;  %v487_v11 = vld [vmem:[%s656_s1 + $0x28] sm:$0xff]  }
   0x4   :  { %v480_v4 = vld [vmem:[%s656_s1 + $0xb8] sm:$0xff]   ;;  %432 = vmatpush3.bf16.msra.mxu0 %v479_v3  ;;  %v484_v8 = vld [vmem:[%s656_s1 + $0xb0] sm:$0xff]   ;;  %v488_v12 = vld [vmem:[%s656_s1 + $0xa8] sm:$0xff]  }
   0x5   :  { %454 = vmatpush3.bf16.msra.mxu1 %v480_v4  ;;  %433 = vmatprep.subr.bf16.mxu0 %v481_v5  ;;  %v489_v13 = vld [vmem:[%s656_s1 + $0x60] sm:$0xff]   ;;  %v493_v17 = vld [vmem:[%s656_s1 + $0x58] sm:$0xff]   ;;  %v497_v21 = vld [vmem:[%s656_s1 + $0x50] sm:$0xff]  }
   0x6   :  { %455 = vmatprep.subr.bf16.mxu1 %v482_v6  ;;  %v490_v14 = vld [vmem:[%s656_s1 + $0xe0] sm:$0xff]   ;;  %v494_v18 = vld [vmem:[%s656_s1 + $0xd8] sm:$0xff]   ;;  %v498_v22 = vld [vmem:[%s656_s1 + $0xd0] sm:$0xff]  }
   0x7   :  { %v491_v15 = vld [vmem:[%s656_s1 + $0x20] sm:$0xff]   ;;  %v495_v19 = vld [vmem:[%s656_s1 + $0x18] sm:$0xff]   ;;  %v499_v23 = vld [vmem:[%s656_s1 + $0x10] sm:$0xff]  }
   0x8   :  { %434 = vmatpush3.bf16.msra.mxu0 %v483_v7  ;;  %v492_v16 = vld [vmem:[%s656_s1 + $0xa0] sm:$0xff]   ;;  %v496_v20 = vld [vmem:[%s656_s1 + $0x98] sm:$0xff]   ;;  %v500_v24 = vld [vmem:[%s656_s1 + $0x90] sm:$0xff]  }
   0x9   :  { %456 = vmatpush3.bf16.msra.mxu1 %v484_v8  ;;  %435 = vmatprep.subr.bf16.mxu0 %v485_v9  ;;  %v501_v25 = vld [vmem:[%s656_s1 + $0x48] sm:$0xff]   ;;  %v505_v29 = vld [vmem:[%s656_s1 + $0x40] sm:$0xff]  }
   0xa   :  { %457 = vmatprep.subr.bf16.mxu1 %v486_v10  ;;  %v502_v26 = vld [vmem:[%s656_s1 + $0xc8] sm:$0xff]   ;;  %v506_v30 = vld [vmem:[%s656_s1 + $0xc0] sm:$0xff]  }
   0xb   :  { %v503_v27 = vld [vmem:[%s656_s1 + $0x8] sm:$0xff]   ;;  %v507_v31 = vld [vmem:[%s656_s1] sm:$0xff]  }
   0xc   :  { %436 = vmatpush3.bf16.msra.mxu0 %v487_v11  ;;  %v504_v28 = vld [vmem:[%s656_s1 + $0x88] sm:$0xff]   ;;  %v508_v32 = vld [vmem:[%s656_s1 + $0x80] sm:$0xff]  }
   0xd   :  { %458 = vmatpush3.bf16.msra.mxu1 %v488_v12  ;;  %437 = vmatprep.subr.bf16.mxu0 %v489_v13  ;;  %v509_v33 = vld [vmem:[%s657_s0] ss:$16 sps:$4 sm:$0xff]   ;;  %v511_v34 = vld [vmem:[%s657_s0 + $0x4] ss:$16 sps:$4 sm:$0xff]   ;;  %v512_v35 = vld [vmem:[%s657_s0 + $0x8] ss:$16 sps:$4 sm:$0xff]  }
   0xe   :  { %459 = vmatprep.subr.bf16.mxu1 %v490_v14  ;;  %v514_v36 = vld [vmem:[%s657_s0 + $0xc] ss:$16 sps:$4 sm:$0xff]   ;;  %v83_v37 = vld [vmem:[%s658_s2] sm:$0xff]  ;;  %339 = vmatprep.mubr.bf16.mxu0 %v511_v34 }
   0xf   :  { %87 = vperm.xlu0 %476, %v83_v37   ;;  %380 = vmatprep.mubr.bf16.mxu1 %v514_v36  ;;  %v84_v38 = vld [vmem:[%s658_s2 + $0x8] sm:$0xff] }
  0x10   :  { %438 = vmatpush3.bf16.msra.mxu0 %v491_v15 }
  0x11   :  { %460 = vmatpush3.bf16.msra.mxu1 %v492_v16  ;;  %439 = vmatprep.subr.bf16.mxu0 %v493_v17 }
  0x12   :  { %461 = vmatprep.subr.bf16.mxu1 %v494_v18 }
  0x13   :  { %92 = vperm.xlu0 %476, %v84_v38  }
  0x14   :  { %440 = vmatpush3.bf16.msra.mxu0 %v495_v19 }
  0x15   :  { %462 = vmatpush3.bf16.msra.mxu1 %v496_v20  ;;  %441 = vmatprep.subr.bf16.mxu0 %v497_v21 }
  0x16   :  { %463 = vmatprep.subr.bf16.mxu1 %v498_v22 }
  0x18   :  { %442 = vmatpush3.bf16.msra.mxu0 %v499_v23 }
  0x19   :  { %464 = vmatpush3.bf16.msra.mxu1 %v500_v24  ;;  %443 = vmatprep.subr.bf16.mxu0 %v501_v25 }
  0x1a   :  { %465 = vmatprep.subr.bf16.mxu1 %v502_v26 }
  0x1c   :  { %444 = vmatpush3.bf16.msra.mxu0 %v503_v27 }
  0x1d   :  { %466 = vmatpush3.bf16.msra.mxu1 %v504_v28  ;;  %445 = vmatprep.subr.bf16.mxu0 %v505_v29 }
  0x1e   :  { %467 = vmatprep.subr.bf16.mxu1 %v506_v30 }
  0x20   :  { %446 = vmatpush3.bf16.msra.mxu0 %v507_v31 }
  0x21   :  { %468 = vmatpush3.bf16.msra.mxu1 %v508_v32 }
  0x23   :  { %340 = vmatmul.mubr.bf16.vlgmr.msra.gmra.mxu0 %v509_v33 }
  0x24   :  { %381 = vmatmul.mubr.bf16.vlgmr.msra.gmra.mxu1 %v512_v35 }
  0x8a   :  { %v88_v41 = vpop.permute.xlu0 %87 }
  0x8e   :  { %v93_v53 = vpop.permute.xlu0 %92 }
  0xe3   :  { %v447_v39 = vpop.f32.mrf.mxu0 }
  0xe4   :  { %v469_v40 = vpop.f32.mrf.mxu1 }
  0xe5   :  { %v448_v42 = vpop.f32.mrf.mxu0 }
  0xe6   :  { %v449_v43 = vadd.f32 %v448_v42, %v447_v39  ;;  %v470_v44 = vpop.f32.mrf.mxu1 }
  0xe7   :  { %v450_v45 = vpop.f32.mrf.mxu0  ;;  %v471_v47 = vadd.f32 %v470_v44, %v469_v40 }
  0xe8   :  { %v342_v46 = vadd.f32 %v449_v43, %v88_v41  ;;  %v472_v48 = vpop.f32.mrf.mxu1 }
  0xe9   :  { %v451_v49 = vpop.f32.mrf.mxu0 }
  0xea   :  { %v383_v50 = vadd.f32 %v471_v47, %v342_v46  ;;  %v452_v51 = vadd.f32 %v451_v49, %v450_v45  ;;  %v473_v52 = vpop.f32.mrf.mxu1 }
  0xeb   :  { %v474_v55 = vadd.f32 %v473_v52, %v472_v48 }
  0xec   :  { %389 = vst [vmem:[%s659_s3] sm:$0xff] %v383_v50  ;;  %v345_v54 = vadd.f32 %v452_v51, %v93_v53 }
  0xee   :  { %v386_v56 = vadd.f32 %v474_v55, %v345_v54 }
  0xf0   :  { %390 = vst [vmem:[%s659_s3 + $0x8] sm:$0xff] %v386_v56 }

// kernel: condigan_discriminator_forward.23
= control target key start
LH: loop header
LB: loop body
LE: loop exit
PB: predicated region body
PF: predicated region fallthrough
CT: control target
= control target key end

     0   :  { %v600_v5 = vmov 0   ;;  %v90_v24 = vlaneseq  ;;  %v601_v25 = vmov 1966171168   ;;  %v602_v42 = vmov 0.0   ;;  %s732_s1 = inlined_call_operand.vmem [shape: bf16[528,128], index: 1, kind: input, shape index: {}]   ;;  %s733_s2 = inlined_call_operand.<no memory space> [shape: f32[1,1], index: 2, kind: input, shape index: {}]   ;;  %s734_s0 = inlined_call_operand.vmem [shape: bf16[1,528], index: 0, kind: input, shape index: {}]   ;;  %s735_s3 = inlined_call_operand.vmem [shape: f32[1,128], index: 3, kind: output, shape index: {}]  }
   0x1   :  { %v562_v0 = vld [vmem:[%s732_s1 + $0x78] sm:$0xff]   ;;  %v8_v1 = vstv %s733_s2  ;;  %561 = vset.pattern.permute.xlu0 %v600_v5  ;;  %v566_v6 = vld [vmem:[%s732_s1 + $0x70] sm:$0xff]   ;;  %v570_v10 = vld [vmem:[%s732_s1 + $0x68] sm:$0xff]   ;;  %v97_v26 = vunpack.c.l.s4 %v601_v25  ;;  %vm603_vm0 = vmmov 0   ;;  %vm336_vm1 = vcmask 130048  }
   0x2   :  { %v563_v2 = vld [vmem:[%s732_s1 + $0xf8] sm:$0xff]   ;;  %9 = vst [vmem:[#allocation2] sm:$0x1] %v8_v1  ;;  %505 = vmatprep.subr.bf16.mxu0 %v562_v0  ;;  %v567_v7 = vld [vmem:[%s732_s1 + $0xf0] sm:$0xff]   ;;  %v571_v11 = vld [vmem:[%s732_s1 + $0xe8] sm:$0xff]   ;;  %v91_v31 = vshrl.u32 %v90_v24, 7 }
   0x3   :  { %v564_v3 = vld [vmem:[%s732_s1 + $0x38] sm:$0xff]   ;;  %527 = vmatprep.subr.bf16.mxu1 %v563_v2  ;;  %v568_v8 = vld [vmem:[%s732_s1 + $0x30] sm:$0xff]   ;;  %v572_v12 = vld [vmem:[%s732_s1 + $0x28] sm:$0xff]   ;;  %v98_v32 = vunpack.c.0.s8 %v97_v26 }
   0x4   :  { %v565_v4 = vld [vmem:[%s732_s1 + $0xb8] sm:$0xff]   ;;  %506 = vmatpush3.bf16.msra.mxu0 %v564_v3  ;;  %v569_v9 = vld [vmem:[%s732_s1 + $0xb0] sm:$0xff]   ;;  %v573_v13 = vld [vmem:[%s732_s1 + $0xa8] sm:$0xff]   ;;  %v92_v53 = vsub.s32 0, %v91_v31 }
   0x5   :  { %528 = vmatpush3.bf16.msra.mxu1 %v565_v4  ;;  %507 = vmatprep.subr.bf16.mxu0 %v566_v6  ;;  %v574_v14 = vld [vmem:[%s732_s1 + $0x60] sm:$0xff]   ;;  %v578_v18 = vld [vmem:[%s732_s1 + $0x58] sm:$0xff]   ;;  %v582_v22 = vld [vmem:[%s732_s1 + $0x50] sm:$0xff]   ;;  %v101_v37 = vsub.s32 %v98_v32, %v91_v31 }
   0x6   :  { %529 = vmatprep.subr.bf16.mxu1 %v567_v7  ;;  %v575_v15 = vld [vmem:[%s732_s1 + $0xe0] sm:$0xff]   ;;  %v579_v19 = vld [vmem:[%s732_s1 + $0xd8] sm:$0xff]   ;;  %v583_v23 = vld [vmem:[%s732_s1 + $0xd0] sm:$0xff]  }
   0x7   :  { %v576_v16 = vld [vmem:[%s732_s1 + $0x20] sm:$0xff]   ;;  %v580_v20 = vld [vmem:[%s732_s1 + $0x18] sm:$0xff]   ;;  %v584_v27 = vld [vmem:[%s732_s1 + $0x10] sm:$0xff]  }
   0x8   :  { %508 = vmatpush3.bf16.msra.mxu0 %v568_v8  ;;  %v577_v17 = vld [vmem:[%s732_s1 + $0xa0] sm:$0xff]   ;;  %v581_v21 = vld [vmem:[%s732_s1 + $0x98] sm:$0xff]   ;;  %v585_v28 = vld [vmem:[%s732_s1 + $0x90] sm:$0xff]  }
   0x9   :  { %530 = vmatpush3.bf16.msra.mxu1 %v569_v9  ;;  %509 = vmatprep.subr.bf16.mxu0 %v570_v10  ;;  %v586_v29 = vld [vmem:[%s732_s1 + $0x48] sm:$0xff]   ;;  %v590_v35 = vld [vmem:[%s732_s1 + $0x40] sm:$0xff]  }
   0xa   :  { %531 = vmatprep.subr.bf16.mxu1 %v571_v11  ;;  %v587_v30 = vld [vmem:[%s732_s1 + $0xc8] sm:$0xff]   ;;  %v591_v36 = vld [vmem:[%s732_s1 + $0xc0] sm:$0xff]  }
   0xb   :  { %v588_v33 = vld [vmem:[%s732_s1 + $0x8] sm:$0xff]   ;;  %v592_v38 = vld [vmem:[%s732_s1] sm:$0xff]  }
   0xc   :  { %510 = vmatpush3.bf16.msra.mxu0 %v572_v12  ;;  %v589_v34 = vld [vmem:[%s732_s1 + $0x88] sm:$0xff]   ;;  %v593_v39 = vld [vmem:[%s732_s1 + $0x80] sm:$0xff]  }
   0xd   :  { %532 = vmatpush3.bf16.msra.mxu1 %v573_v13  ;;  %511 = vmatprep.subr.bf16.mxu0 %v574_v14  ;;  %v17_v40 = vld [vmem:[%s734_s0] sm:$0x1f] }
   0xe   :  { %533 = vmatprep.subr.bf16.mxu1 %v575_v15  ;;  %v102_v41 = vrot.slane %v17_v40, %v101_v37  ;;  %v84_v43 = vld [vmem:[#allocation2] sm:$0x1]  ;;  %v95_v46 = vcombine.high %v17_v40, %v17_v40 }
   0xf   :  { %87 = vperm.xlu0 %561, %v84_v43   ;;  %v595_v48 = vld [vmem:[%s732_s1 + $0x100] sm:$0xff]  }
  0x10   :  { %512 = vmatpush3.bf16.msra.mxu0 %v576_v16  ;;  %v110_v44 = vcombine.high %v102_v41, %v102_v41  ;;  %v117_v45 = vrot.slane %v102_v41, %v101_v37  ;;  %v109_v51 = vrot.slane %v95_v46, %v101_v37 }
  0x11   :  { %534 = vmatpush3.bf16.msra.mxu1 %v577_v17  ;;  %513 = vmatprep.subr.bf16.mxu0 %v578_v18 }
  0x12   :  { %535 = vmatprep.subr.bf16.mxu1 %v579_v19  ;;  %v131_v47 = vrot.slane %v110_v44, %v101_v37  ;;  %v132_v49 = vcombine.high %v117_v45, %v117_v45  ;;  %v124_v52 = vrot.slane %v109_v51, %v101_v37 }
  0x14   :  { %514 = vmatpush3.bf16.msra.mxu0 %v580_v20  ;;  %372 = vmatprep.mubr.bf16.mxu0 %v131_v47  ;;  %v133_v50 = vcombine.high %v131_v47, %v131_v47 }
  0x15   :  { %536 = vmatpush3.bf16.msra.mxu1 %v581_v21  ;;  %515 = vmatprep.subr.bf16.mxu0 %v582_v22 }
  0x16   :  { %537 = vmatprep.subr.bf16.mxu1 %v583_v23  ;;  %412 = vmatprep.mubr.bf16.mxu1 %v133_v50 }
  0x18   :  { %516 = vmatpush3.bf16.msra.mxu0 %v584_v27 }
  0x19   :  { %538 = vmatpush3.bf16.msra.mxu1 %v585_v28  ;;  %517 = vmatprep.subr.bf16.mxu0 %v586_v29 }
  0x1a   :  { %539 = vmatprep.subr.bf16.mxu1 %v587_v30 }
  0x1c   :  { %518 = vmatpush3.bf16.msra.mxu0 %v588_v33 }
  0x1d   :  { %540 = vmatpush3.bf16.msra.mxu1 %v589_v34  ;;  %519 = vmatprep.subr.bf16.mxu0 %v590_v35 }
  0x1e   :  { %541 = vmatprep.subr.bf16.mxu1 %v591_v36 }
  0x20   :  { %520 = vmatpush3.bf16.msra.mxu0 %v592_v38 }
  0x21   :  { %542 = vmatpush3.bf16.msra.mxu1 %v593_v39  ;;  %551 = vmatprep.subr.bf16.mxu0 %v602_v42 }
  0x23   :  { %373 = vmatmul.mubr.bf16.vlgmr.msra.gmra.mxu0 %v117_v45 }
  0x24   :  { %552 = vmatpush3.bf16.msra.mxu0 %v595_v48  ;;  %413 = vmatmul.mubr.bf16.vlgmr.msra.gmra.mxu1 %v132_v49 }
  0x25   :  { %553 = vmatprep.mubr.msk.bf16.mxu0 %vm603_vm0, %v602_v42 }
  0x2b   :  { %554 = vmatmul.mubr.msk.bf16.vlgmr.msra.gmra.mxu0 %vm336_vm1, %v124_v52 }
  0x8a   :  { %v88_v54 = vpop.permute.xlu0 %87 }
  0x8b   :  { %v93_v56 = vrot.slane %v88_v54, %v92_v53 }
  0xe3   :  { %v521_v55 = vpop.f32.mrf.mxu0 }
  0xe4   :  { %v543_v57 = vpop.f32.mrf.mxu1 }
  0xe5   :  { %v522_v58 = vpop.f32.mrf.mxu0 }
  0xe6   :  { %v523_v59 = vadd.f32 %v522_v58, %v521_v55  ;;  %v544_v60 = vpop.f32.mrf.mxu1 }
  0xe7   :  { %v524_v61 = vpop.f32.mrf.mxu0  ;;  %v545_v63 = vadd.f32 %v544_v60, %v543_v57 }
  0xe8   :  { %v375_v62 = vadd.f32 %v523_v59, %v93_v56  ;;  %v546_v0 = vpop.f32.mrf.mxu1 }
  0xe9   :  { %v525_v1 = vpop.f32.mrf.mxu0 }
  0xea   :  { %v415_v2 = vadd.f32 %v545_v63, %v375_v62  ;;  %v547_v3 = vpop.f32.mrf.mxu1 }
  0xeb   :  { %v454_v4 = vpop.f32.mrf.mxu0 }
  0xec   :  { %v455_v5 = vadd.f32 %v454_v4, %v415_v2 }
  0xed   :  { %v555_v6 = vpop.f32.mrf.mxu0 }
  0xee   :  { %v460_v7 = vsub.f32 0.0, %v455_v5 }
  0xef   :  { %v457_v8 = vpop.f32.mrf.mxu0 }
  0xf0   :  { %v461_v9 = vmul.f32 1.442695, %v460_v7 }
  0xf1   :  { %v556_v10 = vpop.f32.mrf.mxu0 }
  0xf2   :  { %596 = vpow2.f32 %v461_v9 }
  0xff   :  { %v597_v11 = vpop.eup %596 }
 0x100   :  { %v463_v12 = vadd.f32 1.0, %v597_v11 }
 0x102   :  { %598 = vrcp.f32 %v463_v12 }
 0x10f   :  { %v599_v13 = vpop.eup %598 }
 0x110   :  { %466 = vst [vmem:[%s735_s3] sm:$0x1] %v599_v13 }

</bundles_post_ra>
